<compile_context>
chip_gen: v6e
topology: v6e:2x2x1
jax: 0.10.0
libtpu: 0.0.40
codegen_flags: <defaults>
</compile_context>

<pallas_src>
import functools
import math

import jax
import jax.numpy as jnp
from jax.experimental import pallas as pl
from jax.experimental.pallas import tpu as pltpu


# --------------------------- device-aware budgets ---------------------------

_BUDGET = None


def _device_budget():
    """(vmem_limit_bytes, max vocab tile) adapted to the TPU generation."""
    global _BUDGET
    if _BUDGET is None:
        try:
            vmem = int(pltpu.get_tpu_info().vmem_capacity_bytes)
        except Exception:            # unknown / emulated device -> conservative
            vmem = 64 * 1024 * 1024
        if vmem > 96 * 1024 * 1024:  # v5e / v6e class (128 MiB VMEM per core)
            _BUDGET = (100 * 1024 * 1024, 2048)
        else:                        # v7x class (64 MiB VMEM) or unknown
            _BUDGET = (48 * 1024 * 1024, 512)
    return _BUDGET


# -------- capability probe: single-buffered (constant) input BlockSpecs -----

_SB_SUPPORTED = None


def _probe_kernel(x_ref, o_ref):
    o_ref[...] = x_ref[...]


def _single_buffer_supported():
    """True iff BlockSpec(pipeline_mode=pl.Buffered(1)) compiles here."""
    global _SB_SUPPORTED
    if _SB_SUPPORTED is None:
        try:
            f = pl.pallas_call(
                _probe_kernel,
                out_shape=jax.ShapeDtypeStruct((16, 128), jnp.float32),
                grid=(2,),
                in_specs=[pl.BlockSpec((8, 128), lambda i: (0, 0),
                                       pipeline_mode=pl.Buffered(1))],
                out_specs=pl.BlockSpec((8, 128), lambda i: (i, 0)),
            )
            jax.block_until_ready(f(jnp.ones((8, 128), jnp.float32)))
            _SB_SUPPORTED = True
        except Exception:
            _SB_SUPPORTED = False
    return _SB_SUPPORTED


def _const_spec(a):
    """BlockSpec for a weight that is identical at every grid step.

    Constant index_map -> fetched once; single buffering (when supported)
    halves its VMEM footprint vs. the default double buffering.
    """
    nd = a.ndim
    idx = lambda *_, _nd=nd: (0,) * _nd
    if _single_buffer_supported():
        return pl.BlockSpec(a.shape, idx, pipeline_mode=pl.Buffered(1))
    return pl.BlockSpec(a.shape, idx)


# ----------------------------- kernel helpers ------------------------------

def _layernorm(x, g, b, eps=1e-5):
    mu = jnp.mean(x, axis=-1, keepdims=True)
    var = jnp.mean((x - mu) ** 2, axis=-1, keepdims=True)
    return (x - mu) * jax.lax.rsqrt(var + eps) * g + b


def _gelu(x):
    # OpenAI tanh-approx gelu (matches the torch.jit.script gelu).
    return 0.5 * x * (1.0 + jnp.tanh(0.7978845608028654 * x * (1.0 + 0.044715 * x * x)))


# ------------------------- transformer layer kernel ------------------------

def transformer_layer_kernel(num_heads, q_tile,
                             x_ref,
                             g_in_ref, b_in_ref,
                             w_qkv_ref, b_qkv_ref,
                             w_out_ref, b_out_ref,
                             g_s1_ref, b_s1_ref,
                             g_lo_ref, b_lo_ref,
                             w1_ref, b1_ref, w2_ref, b2_ref,
                             g_s2_ref, b_s2_ref,
                             o_ref):
    x = x_ref[0]                      # (S, D) f32 residual stream
    S, D = x.shape
    H = num_heads
    d = D // H
    inv_sqrt_d = 1.0 / math.sqrt(d)
    tq = q_tile
    n_tiles = S // tq

    # ---- ln_in (f32) + fused QKV projection (bf16 MXU, f32 accumulation) ----
    ln_in = _layernorm(x, g_in_ref[...], b_in_ref[...])
    qkv = jnp.dot(ln_in.astype(jnp.bfloat16), w_qkv_ref[...],
                  preferred_element_type=jnp.float32) + b_qkv_ref[...]
    # 1/sqrt(d) folded into q (S*D muls instead of H*S^2 score muls).
    q = (qkv[:, :D] * inv_sqrt_d).astype(jnp.bfloat16).reshape(S, H, d)
    k = qkv[:, D:2 * D].astype(jnp.bfloat16).reshape(S, H, d)
    v = qkv[:, 2 * D:].astype(jnp.bfloat16).reshape(S, H, d)

    # ---- flash-style attention: static q/kv tile loops, online softmax ----
    # Heads ride the MXU batch dimension of dot_general; the per-(b,h) cogview
    # pb-relax shift of the reference is a per-row constant and is subsumed by
    # the running row-max subtraction below.
    attn_rows = []
    for qi in range(n_tiles):
        q_blk = q[qi * tq:(qi + 1) * tq]                       # (tq, H, d)
        m_run = jnp.full((H, tq, 1), -jnp.inf, jnp.float32)
        l_run = jnp.zeros((H, tq, 1), jnp.float32)
        acc = jnp.zeros((H, tq, d), jnp.float32)
        for ki in range(qi + 1):      # causal: skip fully-masked upper KV tiles
            k_blk = k[ki * tq:(ki + 1) * tq]                   # (tk, H, d)
            v_blk = v[ki * tq:(ki + 1) * tq]                   # (tk, H, d)
            s = jax.lax.dot_general(
                q_blk, k_blk,
                dimension_numbers=(((2,), (2,)), ((1,), (1,))),
                preferred_element_type=jnp.float32)            # (H, tq, tk)
            if ki == qi:              # diagonal tile -> in-tile causal mask
                r = jax.lax.broadcasted_iota(jnp.int32, (tq, tq), 0)
                c = jax.lax.broadcasted_iota(jnp.int32, (tq, tq), 1)
                s = jnp.where((r >= c)[None, :, :], s, -10000.0)
            m_new = jnp.maximum(m_run, jnp.max(s, axis=-1, keepdims=True))
            alpha = jnp.exp(m_run - m_new)
            p = jnp.exp(s - m_new)
            l_run = alpha * l_run + jnp.sum(p, axis=-1, keepdims=True)
            acc = alpha * acc + jax.lax.dot_general(
                p.astype(jnp.bfloat16), v_blk,
                dimension_numbers=(((2,), (0,)), ((0,), (1,))),
                preferred_element_type=jnp.float32)            # (H, tq, d)
            m_run = m_new
        # EUP reciprocal (approximate, ~1e-3 rel) for the softmax denominator.
        ctx = acc * pl.reciprocal(l_run, approx=True)          # (H, tq, d) f32
        # Output projection stays head-major: contract (d) per head against
        # w_out stored as (H, d, D) and sum over heads -> no transpose/reshape.
        part = jax.lax.dot_general(
            ctx.astype(jnp.bfloat16), w_out_ref[...],
            dimension_numbers=(((2,), (1,)), ((0,), (0,))),
            preferred_element_type=jnp.float32)                # (H, tq, D)
        attn_rows.append(jnp.sum(part, axis=0))                # (tq, D)
    attn_out = attn_rows[0] if n_tiles == 1 else jnp.concatenate(attn_rows, axis=0)
    attn_out = attn_out + b_out_ref[...]

    # ---- sandwich LN #1 + residual ----
    attn_out = _layernorm(attn_out, g_s1_ref[...], b_s1_ref[...])
    x = x + attn_out

    # ---- ln_out + MLP (bf16 MXU, f32 acc) + sandwich LN #2 + residual ----
    ln_out = _layernorm(x, g_lo_ref[...], b_lo_ref[...])
    h1 = jnp.dot(ln_out.astype(jnp.bfloat16), w1_ref[...],
                 preferred_element_type=jnp.float32) + b1_ref[...]
    h1 = _gelu(h1)
    mlp = jnp.dot(h1.astype(jnp.bfloat16), w2_ref[...],
                  preferred_element_type=jnp.float32) + b2_ref[...]
    mlp = _layernorm(mlp, g_s2_ref[...], b_s2_ref[...])

    o_ref[0] = x + mlp
    # TODO(synk): dropout layers have p=0 in this config (identity); the
    # use_cache / rudalle_relax / layernorm_prescale branches are never taken.
    # TODO(synk): at production D, block w_qkv/w1/w2 over a reduction grid axis
    # (f32 VMEM accumulator + pl.when init/finalize) and prefetch the next
    # layer's weights with a cross-pallas_call DMA future (P10) instead of
    # keeping every weight fully resident.
    # TODO(synk): a second "parallel" q-tile grid axis (v7x dual-TC) needs a
    # separate KV-projection pass so K/V are not recomputed per tile; on
    # v5e/v6e the spare VMEM could instead host multiple batch rows per step.


def final_logits_kernel(x_ref, g_f_ref, b_f_ref, g_l_ref, b_l_ref,
                        w_ref, b_ref, o_ref):
    x = x_ref[0]                                          # (R, D) f32
    x = _layernorm(x, g_f_ref[...], b_f_ref[...])         # transformer.final_ln
    x = _layernorm(x, g_l_ref[...], b_l_ref[...])         # to_logits[0] LayerNorm
    o_ref[0] = jnp.dot(x.astype(jnp.bfloat16), w_ref[...],
                       preferred_element_type=jnp.float32) + b_ref[...]


# ------------------------------- wrappers ----------------------------------

def _pick_attn_tile(S):
    if S <= 256:
        return S
    for t in (256, 128, 64, 32, 16, 8):
        if S % t == 0:
            return t
    return S


def _pick_vocab_tile(v_padded, cap):
    # Largest lane-dense (multiple-of-128) tile dividing v_padded, <= cap.
    best = 128
    t = 128
    limit = min(v_padded, cap)
    while t <= limit:
        if v_padded % t == 0:
            best = t
        t += 128
    return best


def run_transformer_layer(x, p, num_heads):
    B, S, D = x.shape
    vmem_limit, _ = _device_budget()
    weights = [p["g_in"], p["b_in"], p["w_qkv"], p["b_qkv"], p["w_out"], p["b_out"],
               p["g_s1"], p["b_s1"], p["g_lo"], p["b_lo"],
               p["w1"], p["b1"], p["w2"], p["b2"], p["g_s2"], p["b_s2"]]
    kernel = functools.partial(transformer_layer_kernel, num_heads, _pick_attn_tile(S))
    return pl.pallas_call(
        kernel,
        out_shape=jax.ShapeDtypeStruct((B, S, D), jnp.float32),
        grid=(B,),
        in_specs=[pl.BlockSpec((1, S, D), lambda i: (i, 0, 0))]
                 + [_const_spec(w) for w in weights],
        out_specs=pl.BlockSpec((1, S, D), lambda i: (i, 0, 0)),
        input_output_aliases={0: 0},           # update residual stream in place
        compiler_params=pltpu.CompilerParams(
            dimension_semantics=("parallel",),
            vmem_limit_bytes=vmem_limit),
    )(x, *weights)


def run_final_logits(x_img, p):
    """final_ln + to_logits, restricted to the image rows, vocab-tiled."""
    B, R, D = x_img.shape
    vmem_limit, tv_cap = _device_budget()
    w = p["w_logits"]
    b = p["b_logits"]
    V = w.shape[-1]
    Vp = ((V + 127) // 128) * 128              # lane-dense padded vocab
    if Vp != V:
        w = jnp.pad(w, ((0, 0), (0, Vp - V)))
        b = jnp.pad(b, ((0, 0), (0, Vp - V)))
    tv = _pick_vocab_tile(Vp, tv_cap)
    ln_params = [p["g_final"], p["b_final"], p["g_tl"], p["b_tl"]]
    out = pl.pallas_call(
        final_logits_kernel,
        out_shape=jax.ShapeDtypeStruct((B, R, Vp), jnp.float32),
        grid=(B, Vp // tv),
        in_specs=[pl.BlockSpec((1, R, D), lambda bi, vt: (bi, 0, 0))]
                 + [_const_spec(g) for g in ln_params]
                 + [pl.BlockSpec((D, tv), lambda bi, vt: (0, vt)),
                    pl.BlockSpec((1, tv), lambda bi, vt: (0, vt))],
        out_specs=pl.BlockSpec((1, R, tv), lambda bi, vt: (bi, 0, vt)),
        compiler_params=pltpu.CompilerParams(
            dimension_semantics=("parallel", "parallel"),
            vmem_limit_bytes=vmem_limit),
    )(x_img, *ln_params, w, b)
    return out[:, :, :V] if Vp != V else out


# ------------------------------ model (glue) --------------------------------

def init_params(key, num_layers, hidden_dim, num_attn_heads,
                image_vocab_size, seg_vocab_size, text_vocab_size,
                image_tokens_per_dim, seg_tokens_per_dim, text_length):
    D = hidden_dim
    H = num_attn_heads
    d = D // H
    keys = iter(jax.random.split(key, 64 + 8 * num_layers))

    def nrm(shape, dtype=jnp.float32):
        return (0.02 * jax.random.normal(next(keys), shape)).astype(dtype)

    params = {
        "text_token_emb": nrm((text_vocab_size, D)),
        "seg_token_emb": nrm((seg_vocab_size, D)),
        "image_token_emb": nrm((image_vocab_size, D)),
        "text_pos_emb": nrm((text_length, D)),
        "seg_row_emb": nrm((seg_tokens_per_dim, D)),
        "seg_col_emb": nrm((seg_tokens_per_dim, D)),
        "image_row_emb": nrm((image_tokens_per_dim, D)),
        "image_col_emb": nrm((image_tokens_per_dim, D)),
        "g_final": jnp.ones((1, D), jnp.float32), "b_final": jnp.zeros((1, D), jnp.float32),
        "g_tl": jnp.ones((1, D), jnp.float32), "b_tl": jnp.zeros((1, D), jnp.float32),
        "w_logits": nrm((D, image_vocab_size), jnp.bfloat16),
        "b_logits": jnp.zeros((1, image_vocab_size), jnp.float32),
        "layers": [],
    }
    for _ in range(num_layers):
        lp = {
            "g_in": jnp.ones((1, D), jnp.float32), "b_in": jnp.zeros((1, D), jnp.float32),
            "w_qkv": nrm((D, 3 * D), jnp.bfloat16), "b_qkv": jnp.zeros((1, 3 * D), jnp.float32),
            # out-projection weight kept head-major (H, d, D) so the kernel
            # never has to transpose the context back to (S, D).
            "w_out": nrm((H, d, D), jnp.bfloat16), "b_out": jnp.zeros((1, D), jnp.float32),
            "g_s1": jnp.ones((1, D), jnp.float32), "b_s1": jnp.zeros((1, D), jnp.float32),
            "g_lo": jnp.ones((1, D), jnp.float32), "b_lo": jnp.zeros((1, D), jnp.float32),
            "w1": nrm((D, 4 * D), jnp.bfloat16), "b1": jnp.zeros((1, 4 * D), jnp.float32),
            "w2": nrm((4 * D, D), jnp.bfloat16), "b2": jnp.zeros((1, D), jnp.float32),
            "g_s2": jnp.ones((1, D), jnp.float32), "b_s2": jnp.zeros((1, D), jnp.float32),
        }
        params["layers"].append(lp)
    return params


def make_a_scene_forward(params, text_tokens, seg_tokens, img_tokens, cfg):
    H = cfg["num_attn_heads"]
    text_length = cfg["text_length"]
    seg_tpd = cfg["seg_tokens_per_dim"]
    img_tpd = cfg["image_tokens_per_dim"]
    text_vocab_size = cfg["text_vocab_size"]
    image_length = img_tpd ** 2

    # ---- embeddings (glue: gathers) ----
    text_range = jnp.arange(text_length, dtype=jnp.int32) + (text_vocab_size - text_length)
    text_tokens = jnp.where(text_tokens == 0, text_range[None, :], text_tokens)
    text_pos = params["text_pos_emb"][jnp.arange(text_tokens.shape[1])]
    text_emb = params["text_token_emb"][text_tokens] + text_pos[None, :, :]

    seg_idx = jnp.arange(seg_tokens.shape[1], dtype=jnp.int32)
    seg_pos = params["seg_row_emb"][seg_idx // seg_tpd] + params["seg_col_emb"][seg_idx % seg_tpd]
    seg_emb = params["seg_token_emb"][seg_tokens] + seg_pos[None, :, :]

    img_idx = jnp.arange(img_tokens.shape[1], dtype=jnp.int32)
    img_pos = params["image_row_emb"][img_idx // img_tpd] + params["image_col_emb"][img_idx % img_tpd]
    img_emb = params["image_token_emb"][img_tokens] + img_pos[None, :, :]

    x = jnp.concatenate([text_emb, seg_emb, img_emb], axis=1).astype(jnp.float32)
    S = x.shape[1]

    # NOTE: the reference's attention_mask * Transformer.mask product collapses
    # to a pure causal mask for every layer (the prefix-bidirectional block is
    # re-multiplied by the lower-triangular layer mask), so the mask is built
    # in-kernel from iota and no (B,1,S,S) mask is streamed through HBM.

    # ---- transformer layers (fused Pallas kernels, in-place residual) ----
    for lp in params["layers"]:
        x = run_transformer_layer(x, lp, H)

    # ---- final_ln + to_logits only on the rows the reference keeps ----
    # reference: logits[:, -image_length-1:-1, :]; all remaining ops are
    # position-wise so slicing first is exactly equivalent and removes the
    # wasted (S - image_length)/S share of the dominant D x V matmul.
    x_img = x[:, S - image_length - 1:S - 1, :]
    return run_final_logits(x_img, params)


# --------------------------------- main -------------------------------------

if __name__ == "__main__":
    cfg = dict(
        num_layers=2,
        hidden_dim=32,
        num_attn_heads=4,
        image_vocab_size=384,      # multiple of 128 -> exercises vocab tiling
        seg_vocab_size=16,
        text_vocab_size=48,
        image_tokens_per_dim=4,
        seg_tokens_per_dim=2,
        text_length=12,            # S = 12 + 4 + 16 = 32
    )
    B = 2
    key = jax.random.PRNGKey(0)
    kp, kt, ks, ki = jax.random.split(key, 4)

    params = init_params(kp, cfg["num_layers"], cfg["hidden_dim"], cfg["num_attn_heads"],
                         cfg["image_vocab_size"], cfg["seg_vocab_size"], cfg["text_vocab_size"],
                         cfg["image_tokens_per_dim"], cfg["seg_tokens_per_dim"], cfg["text_length"])

    text_tokens = jax.random.randint(kt, (B, cfg["text_length"]), 0, cfg["text_vocab_size"], dtype=jnp.int32)
    seg_tokens = jax.random.randint(ks, (B, cfg["seg_tokens_per_dim"] ** 2), 0, cfg["seg_vocab_size"], dtype=jnp.int32)
    img_tokens = jax.random.randint(ki, (B, cfg["image_tokens_per_dim"] ** 2), 0, cfg["image_vocab_size"], dtype=jnp.int32)

    # Warm the capability probe / device budget outside of jit tracing.
    _single_buffer_supported()
    _device_budget()

    forward = jax.jit(functools.partial(make_a_scene_forward, cfg=cfg))
    logits = forward(params, text_tokens, seg_tokens, img_tokens)
    logits = jax.block_until_ready(logits)

    expected_shape = (B, cfg["image_tokens_per_dim"] ** 2, cfg["image_vocab_size"])
    assert logits.shape == expected_shape, (logits.shape, expected_shape)
    assert bool(jnp.all(jnp.isfinite(logits)))
    print("KERNEL_OK")
</pallas_src>

<mosaic_0001>
module attributes {stable_mosaic.version = 11 : i64} {
  func.func @_probe_kernel(%arg0: i32, %arg1: memref<8x128xf32, #tpu.memory_space<vmem>>, %arg2: memref<8x128xf32, #tpu.memory_space<vmem>>) attributes {dimension_semantics = [#tpu.dimension_semantics<arbitrary>], iteration_bounds = array<i64: 2>, scalar_prefetch = 0 : i64, scratch_operands = 0 : i64, tpu.core_type = #tpu.core_type<tc>, window_params = [{pipeline_mode = #tpu.pipeline_mode<synchronous>, transform_indices = @transform_0, window_bounds = array<i64: 8, 128>}, {transform_indices = @transform_1, window_bounds = array<i64: 8, 128>}]} {
    %c0 = arith.constant 0 : index
    %c0_0 = arith.constant 0 : index
    %0 = vector.load %arg1[%c0, %c0_0] : memref<8x128xf32, #tpu.memory_space<vmem>>, vector<8x128xf32>
    %c0_1 = arith.constant 0 : index
    %c0_2 = arith.constant 0 : index
    %1 = vector.load %arg2[%c0_1, %c0_2] : memref<8x128xf32, #tpu.memory_space<vmem>>, vector<8x128xf32>
    tpu.vector_store %arg2[%c0_1, %c0_2], %0 {strides = array<i32>} : memref<8x128xf32, #tpu.memory_space<vmem>>, vector<8x128xf32>,
    return
  }
  func.func @transform_0(%arg0: i32) -> (i32, i32) {
    %c0_i32 = arith.constant 0 : i32
    %c0_i32_0 = arith.constant 0 : i32
    %c0_i32_1 = arith.constant 0 : i32
    return %c0_i32, %c0_i32_0 : i32, i32
  }
  func.func @transform_1(%arg0: i32) -> (i32, i32) {
    %c0_i32 = arith.constant 0 : i32
    %c0_i32_0 = arith.constant 0 : i32
    return %arg0, %c0_i32 : i32, i32
  }
}

module attributes {stable_mosaic.version = 11 : i64} {
  func.func @final_logits_kernel(%arg0: i32, %arg1: i32, %arg2: memref<1x16x32xf32, #tpu.memory_space<vmem>>, %arg3: memref<1x32xf32, #tpu.memory_space<vmem>>, %arg4: memref<1x32xf32, #tpu.memory_space<vmem>>, %arg5: memref<1x32xf32, #tpu.memory_space<vmem>>, %arg6: memref<1x32xf32, #tpu.memory_space<vmem>>, %arg7: memref<32x384xbf16, #tpu.memory_space<vmem>>, %arg8: memref<1x384xf32, #tpu.memory_space<vmem>>, %arg9: memref<1x16x384xf32, #tpu.memory_space<vmem>>) attributes {dimension_semantics = [#tpu.dimension_semantics<parallel>, #tpu.dimension_semantics<parallel>], iteration_bounds = array<i64: 2, 1>, scalar_prefetch = 0 : i64, scratch_operands = 0 : i64, tpu.core_type = #tpu.core_type<tc>, window_params = [{transform_indices = @transform_0, window_bounds = array<i64: 1, 16, 32>}, {pipeline_mode = #tpu.pipeline_mode<synchronous>, transform_indices = @transform_1, window_bounds = array<i64: 1, 32>}, {pipeline_mode = #tpu.pipeline_mode<synchronous>, transform_indices = @transform_2, window_bounds = array<i64: 1, 32>}, {pipeline_mode = #tpu.pipeline_mode<synchronous>, transform_indices = @transform_3, window_bounds = array<i64: 1, 32>}, {pipeline_mode = #tpu.pipeline_mode<synchronous>, transform_indices = @transform_4, window_bounds = array<i64: 1, 32>}, {transform_indices = @transform_5, window_bounds = array<i64: 32, 384>}, {transform_indices = @transform_6, window_bounds = array<i64: 1, 384>}, {transform_indices = @transform_7, window_bounds = array<i64: 1, 16, 384>}]} {
    %c0 = arith.constant 0 : index
    %c0_0 = arith.constant 0 : index
    %c0_1 = arith.constant 0 : index
    %0 = vector.load %arg2[%c0, %c0_0, %c0_1] : memref<1x16x32xf32, #tpu.memory_space<vmem>>, vector<1x16x32xf32>
    %1 = vector.shape_cast %0 : vector<1x16x32xf32> to vector<16x32xf32>
    %c0_2 = arith.constant 0 : index
    %c0_3 = arith.constant 0 : index
    %2 = vector.load %arg3[%c0_2, %c0_3] : memref<1x32xf32, #tpu.memory_space<vmem>>, vector<1x32xf32>
    %c0_4 = arith.constant 0 : index
    %c0_5 = arith.constant 0 : index
    %3 = vector.load %arg4[%c0_4, %c0_5] : memref<1x32xf32, #tpu.memory_space<vmem>>, vector<1x32xf32>
    %cst = arith.constant dense<0.000000e+00> : vector<16xf32>
    %4 = vector.multi_reduction <add>, %1, %cst [1] : vector<16x32xf32> to vector<16xf32>
    %5 = vector.shape_cast %4 : vector<16xf32> to vector<16x1xf32>
    %cst_6 = arith.constant 3.200000e+01 : f32
    %6 = vector.broadcast %cst_6 : f32 to vector<16x1xf32>
    %7 = arith.divf %5, %6 : vector<16x1xf32>
    %8 = vector.broadcast %7 : vector<16x1xf32> to vector<16x32xf32>
    %9 = arith.subf %1, %8 : vector<16x32xf32>
    %10 = arith.mulf %9, %9 : vector<16x32xf32>
    %cst_7 = arith.constant dense<0.000000e+00> : vector<16xf32>
    %11 = vector.multi_reduction <add>, %10, %cst_7 [1] : vector<16x32xf32> to vector<16xf32>
    %12 = vector.shape_cast %11 : vector<16xf32> to vector<16x1xf32>
    %cst_8 = arith.constant 3.200000e+01 : f32
    %13 = vector.broadcast %cst_8 : f32 to vector<16x1xf32>
    %14 = arith.divf %12, %13 : vector<16x1xf32>
    %15 = vector.broadcast %7 : vector<16x1xf32> to vector<16x32xf32>
    %16 = arith.subf %1, %15 : vector<16x32xf32>
    %cst_9 = arith.constant 9.99999974E-6 : f32
    %17 = vector.broadcast %cst_9 : f32 to vector<16x1xf32>
    %18 = arith.addf %14, %17 : vector<16x1xf32>
    %19 = math.rsqrt %18 : vector<16x1xf32>
    %20 = vector.broadcast %19 : vector<16x1xf32> to vector<16x32xf32>
    %21 = arith.mulf %16, %20 : vector<16x32xf32>
    %22 = vector.broadcast %2 : vector<1x32xf32> to vector<16x32xf32>
    %23 = arith.mulf %21, %22 : vector<16x32xf32>
    %24 = vector.broadcast %3 : vector<1x32xf32> to vector<16x32xf32>
    %25 = arith.addf %23, %24 : vector<16x32xf32>
    %c0_10 = arith.constant 0 : index
    %c0_11 = arith.constant 0 : index
    %26 = vector.load %arg5[%c0_10, %c0_11] : memref<1x32xf32, #tpu.memory_space<vmem>>, vector<1x32xf32>
    %c0_12 = arith.constant 0 : index
    %c0_13 = arith.constant 0 : index
    %27 = vector.load %arg6[%c0_12, %c0_13] : memref<1x32xf32, #tpu.memory_space<vmem>>, vector<1x32xf32>
    %cst_14 = arith.constant dense<0.000000e+00> : vector<16xf32>
    %28 = vector.multi_reduction <add>, %25, %cst_14 [1] : vector<16x32xf32> to vector<16xf32>
    %29 = vector.shape_cast %28 : vector<16xf32> to vector<16x1xf32>
    %cst_15 = arith.constant 3.200000e+01 : f32
    %30 = vector.broadcast %cst_15 : f32 to vector<16x1xf32>
    %31 = arith.divf %29, %30 : vector<16x1xf32>
    %32 = vector.broadcast %31 : vector<16x1xf32> to vector<16x32xf32>
    %33 = arith.subf %25, %32 : vector<16x32xf32>
    %34 = arith.mulf %33, %33 : vector<16x32xf32>
    %cst_16 = arith.constant dense<0.000000e+00> : vector<16xf32>
    %35 = vector.multi_reduction <add>, %34, %cst_16 [1] : vector<16x32xf32> to vector<16xf32>
    %36 = vector.shape_cast %35 : vector<16xf32> to vector<16x1xf32>
    %cst_17 = arith.constant 3.200000e+01 : f32
    %37 = vector.broadcast %cst_17 : f32 to vector<16x1xf32>
    %38 = arith.divf %36, %37 : vector<16x1xf32>
    %39 = vector.broadcast %31 : vector<16x1xf32> to vector<16x32xf32>
    %40 = arith.subf %25, %39 : vector<16x32xf32>
    %cst_18 = arith.constant 9.99999974E-6 : f32
    %41 = vector.broadcast %cst_18 : f32 to vector<16x1xf32>
    %42 = arith.addf %38, %41 : vector<16x1xf32>
    %43 = math.rsqrt %42 : vector<16x1xf32>
    %44 = vector.broadcast %43 : vector<16x1xf32> to vector<16x32xf32>
    %45 = arith.mulf %40, %44 : vector<16x32xf32>
    %46 = vector.broadcast %26 : vector<1x32xf32> to vector<16x32xf32>
    %47 = arith.mulf %45, %46 : vector<16x32xf32>
    %48 = vector.broadcast %27 : vector<1x32xf32> to vector<16x32xf32>
    %49 = arith.addf %47, %48 : vector<16x32xf32>
    %50 = arith.truncf %49 : vector<16x32xf32> to vector<16x32xbf16>
    %c0_19 = arith.constant 0 : index
    %c0_20 = arith.constant 0 : index
    %51 = vector.load %arg7[%c0_19, %c0_20] : memref<32x384xbf16, #tpu.memory_space<vmem>>, vector<32x384xbf16>
    %cst_21 = arith.constant dense<0.000000e+00> : vector<16x384xf32>
    %52 = tpu.matmul %50, %51, %cst_21 {dimension_numbers = #tpu.dot_dimension_numbers<[1], [0], [0], [1], [0, 0, 1, 1], [], []>} : vector<16x32xbf16>, vector<32x384xbf16>, vector<16x384xf32> -> vector<16x384xf32>
    %c0_22 = arith.constant 0 : index
    %c0_23 = arith.constant 0 : index
    %53 = vector.load %arg8[%c0_22, %c0_23] : memref<1x384xf32, #tpu.memory_space<vmem>>, vector<1x384xf32>
    %54 = vector.broadcast %53 : vector<1x384xf32> to vector<16x384xf32>
    %55 = arith.addf %52, %54 : vector<16x384xf32>
    %c0_24 = arith.constant 0 : index
    %c0_25 = arith.constant 0 : index
    %c0_26 = arith.constant 0 : index
    %56 = vector.load %arg9[%c0_24, %c0_25, %c0_26] : memref<1x16x384xf32, #tpu.memory_space<vmem>>, vector<1x16x384xf32>
    %57 = vector.shape_cast %56 : vector<1x16x384xf32> to vector<16x384xf32>
    %58 = vector.shape_cast %55 : vector<16x384xf32> to vector<1x16x384xf32>
    tpu.vector_store %arg9[%c0_24, %c0_25, %c0_26], %58 {strides = array<i32>} : memref<1x16x384xf32, #tpu.memory_space<vmem>>, vector<1x16x384xf32>,
    return
  }
  func.func @transform_0(%arg0: i32, %arg1: i32) -> (i32, i32, i32) {
    %c0_i32 = arith.constant 0 : i32
    %c0_i32_0 = arith.constant 0 : i32
    %c0_i32_1 = arith.constant 0 : i32
    return %arg0, %c0_i32, %c0_i32_0 : i32, i32, i32
  }
  func.func @transform_1(%arg0: i32, %arg1: i32) -> (i32, i32) {
    %c0_i32 = arith.constant 0 : i32
    %c0_i32_0 = arith.constant 0 : i32
    %c0_i32_1 = arith.constant 0 : i32
    return %c0_i32, %c0_i32_0 : i32, i32
  }
  func.func @transform_2(%arg0: i32, %arg1: i32) -> (i32, i32) {
    %c0_i32 = arith.constant 0 : i32
    %c0_i32_0 = arith.constant 0 : i32
    %c0_i32_1 = arith.constant 0 : i32
    return %c0_i32, %c0_i32_0 : i32, i32
  }
  func.func @transform_3(%arg0: i32, %arg1: i32) -> (i32, i32) {
    %c0_i32 = arith.constant 0 : i32
    %c0_i32_0 = arith.constant 0 : i32
    %c0_i32_1 = arith.constant 0 : i32
    return %c0_i32, %c0_i32_0 : i32, i32
  }
  func.func @transform_4(%arg0: i32, %arg1: i32) -> (i32, i32) {
    %c0_i32 = arith.constant 0 : i32
    %c0_i32_0 = arith.constant 0 : i32
    %c0_i32_1 = arith.constant 0 : i32
    return %c0_i32, %c0_i32_0 : i32, i32
  }
  func.func @transform_5(%arg0: i32, %arg1: i32) -> (i32, i32) {
    %c0_i32 = arith.constant 0 : i32
    %c0_i32_0 = arith.constant 0 : i32
    return %c0_i32, %arg1 : i32, i32
  }
  func.func @transform_6(%arg0: i32, %arg1: i32) -> (i32, i32) {
    %c0_i32 = arith.constant 0 : i32
    %c0_i32_0 = arith.constant 0 : i32
    return %c0_i32, %arg1 : i32, i32
  }
  func.func @transform_7(%arg0: i32, %arg1: i32) -> (i32, i32, i32) {
    %c0_i32 = arith.constant 0 : i32
    %c0_i32_0 = arith.constant 0 : i32
    return %arg0, %c0_i32, %arg1 : i32, i32, i32
  }
}

module attributes {stable_mosaic.version = 11 : i64} {
  func.func @transformer_layer_kernel(%arg0: i32, %arg1: memref<1x32x32xf32, #tpu.memory_space<vmem>>, %arg2: memref<1x32xf32, #tpu.memory_space<vmem>>, %arg3: memref<1x32xf32, #tpu.memory_space<vmem>>, %arg4: memref<32x96xbf16, #tpu.memory_space<vmem>>, %arg5: memref<1x96xf32, #tpu.memory_space<vmem>>, %arg6: memref<4x8x32xbf16, #tpu.memory_space<vmem>>, %arg7: memref<1x32xf32, #tpu.memory_space<vmem>>, %arg8: memref<1x32xf32, #tpu.memory_space<vmem>>, %arg9: memref<1x32xf32, #tpu.memory_space<vmem>>, %arg10: memref<1x32xf32, #tpu.memory_space<vmem>>, %arg11: memref<1x32xf32, #tpu.memory_space<vmem>>, %arg12: memref<32x128xbf16, #tpu.memory_space<vmem>>, %arg13: memref<1x128xf32, #tpu.memory_space<vmem>>, %arg14: memref<128x32xbf16, #tpu.memory_space<vmem>>, %arg15: memref<1x32xf32, #tpu.memory_space<vmem>>, %arg16: memref<1x32xf32, #tpu.memory_space<vmem>>, %arg17: memref<1x32xf32, #tpu.memory_space<vmem>>, %arg18: memref<1x32x32xf32, #tpu.memory_space<vmem>>) attributes {dimension_semantics = [#tpu.dimension_semantics<parallel>], iteration_bounds = array<i64: 2>, scalar_prefetch = 0 : i64, scratch_operands = 0 : i64, tpu.core_type = #tpu.core_type<tc>, window_params = [{transform_indices = @transform_0, window_bounds = array<i64: 1, 32, 32>}, {pipeline_mode = #tpu.pipeline_mode<synchronous>, transform_indices = @transform_1, window_bounds = array<i64: 1, 32>}, {pipeline_mode = #tpu.pipeline_mode<synchronous>, transform_indices = @transform_2, window_bounds = array<i64: 1, 32>}, {pipeline_mode = #tpu.pipeline_mode<synchronous>, transform_indices = @transform_3, window_bounds = array<i64: 32, 96>}, {pipeline_mode = #tpu.pipeline_mode<synchronous>, transform_indices = @transform_4, window_bounds = array<i64: 1, 96>}, {pipeline_mode = #tpu.pipeline_mode<synchronous>, transform_indices = @transform_5, window_bounds = array<i64: 4, 8, 32>}, {pipeline_mode = #tpu.pipeline_mode<synchronous>, transform_indices = @transform_6, window_bounds = array<i64: 1, 32>}, {pipeline_mode = #tpu.pipeline_mode<synchronous>, transform_indices = @transform_7, window_bounds = array<i64: 1, 32>}, {pipeline_mode = #tpu.pipeline_mode<synchronous>, transform_indices = @transform_8, window_bounds = array<i64: 1, 32>}, {pipeline_mode = #tpu.pipeline_mode<synchronous>, transform_indices = @transform_9, window_bounds = array<i64: 1, 32>}, {pipeline_mode = #tpu.pipeline_mode<synchronous>, transform_indices = @transform_10, window_bounds = array<i64: 1, 32>}, {pipeline_mode = #tpu.pipeline_mode<synchronous>, transform_indices = @transform_11, window_bounds = array<i64: 32, 128>}, {pipeline_mode = #tpu.pipeline_mode<synchronous>, transform_indices = @transform_12, window_bounds = array<i64: 1, 128>}, {pipeline_mode = #tpu.pipeline_mode<synchronous>, transform_indices = @transform_13, window_bounds = array<i64: 128, 32>}, {pipeline_mode = #tpu.pipeline_mode<synchronous>, transform_indices = @transform_14, window_bounds = array<i64: 1, 32>}, {pipeline_mode = #tpu.pipeline_mode<synchronous>, transform_indices = @transform_15, window_bounds = array<i64: 1, 32>}, {pipeline_mode = #tpu.pipeline_mode<synchronous>, transform_indices = @transform_16, window_bounds = array<i64: 1, 32>}, {transform_indices = @transform_17, window_bounds = array<i64: 1, 32, 32>}]} {
    %c0 = arith.constant 0 : index
    %c0_0 = arith.constant 0 : index
    %c0_1 = arith.constant 0 : index
    %0 = vector.load %arg1[%c0, %c0_0, %c0_1] : memref<1x32x32xf32, #tpu.memory_space<vmem>>, vector<1x32x32xf32>
    %1 = vector.shape_cast %0 : vector<1x32x32xf32> to vector<32x32xf32>
    %c0_2 = arith.constant 0 : index
    %c0_3 = arith.constant 0 : index
    %2 = vector.load %arg2[%c0_2, %c0_3] : memref<1x32xf32, #tpu.memory_space<vmem>>, vector<1x32xf32>
    %c0_4 = arith.constant 0 : index
    %c0_5 = arith.constant 0 : index
    %3 = vector.load %arg3[%c0_4, %c0_5] : memref<1x32xf32, #tpu.memory_space<vmem>>, vector<1x32xf32>
    %cst = arith.constant dense<0.000000e+00> : vector<32xf32>
    %4 = vector.multi_reduction <add>, %1, %cst [1] : vector<32x32xf32> to vector<32xf32>
    %5 = vector.shape_cast %4 : vector<32xf32> to vector<32x1xf32>
    %cst_6 = arith.constant 3.200000e+01 : f32
    %6 = vector.broadcast %cst_6 : f32 to vector<32x1xf32>
    %7 = arith.divf %5, %6 : vector<32x1xf32>
    %8 = vector.broadcast %7 : vector<32x1xf32> to vector<32x32xf32>
    %9 = arith.subf %1, %8 : vector<32x32xf32>
    %10 = arith.mulf %9, %9 : vector<32x32xf32>
    %cst_7 = arith.constant dense<0.000000e+00> : vector<32xf32>
    %11 = vector.multi_reduction <add>, %10, %cst_7 [1] : vector<32x32xf32> to vector<32xf32>
    %12 = vector.shape_cast %11 : vector<32xf32> to vector<32x1xf32>
    %cst_8 = arith.constant 3.200000e+01 : f32
    %13 = vector.broadcast %cst_8 : f32 to vector<32x1xf32>
    %14 = arith.divf %12, %13 : vector<32x1xf32>
    %15 = vector.broadcast %7 : vector<32x1xf32> to vector<32x32xf32>
    %16 = arith.subf %1, %15 : vector<32x32xf32>
    %cst_9 = arith.constant 9.99999974E-6 : f32
    %17 = vector.broadcast %cst_9 : f32 to vector<32x1xf32>
    %18 = arith.addf %14, %17 : vector<32x1xf32>
    %19 = math.rsqrt %18 : vector<32x1xf32>
    %20 = vector.broadcast %19 : vector<32x1xf32> to vector<32x32xf32>
    %21 = arith.mulf %16, %20 : vector<32x32xf32>
    %22 = vector.broadcast %2 : vector<1x32xf32> to vector<32x32xf32>
    %23 = arith.mulf %21, %22 : vector<32x32xf32>
    %24 = vector.broadcast %3 : vector<1x32xf32> to vector<32x32xf32>
    %25 = arith.addf %23, %24 : vector<32x32xf32>
    %26 = arith.truncf %25 : vector<32x32xf32> to vector<32x32xbf16>
    %c0_10 = arith.constant 0 : index
    %c0_11 = arith.constant 0 : index
    %27 = vector.load %arg4[%c0_10, %c0_11] : memref<32x96xbf16, #tpu.memory_space<vmem>>, vector<32x96xbf16>
    %cst_12 = arith.constant dense<0.000000e+00> : vector<32x96xf32>
    %28 = tpu.matmul %26, %27, %cst_12 {dimension_numbers = #tpu.dot_dimension_numbers<[1], [0], [0], [1], [0, 0, 1, 1], [], []>} : vector<32x32xbf16>, vector<32x96xbf16>, vector<32x96xf32> -> vector<32x96xf32>
    %c0_13 = arith.constant 0 : index
    %c0_14 = arith.constant 0 : index
    %29 = vector.load %arg5[%c0_13, %c0_14] : memref<1x96xf32, #tpu.memory_space<vmem>>, vector<1x96xf32>
    %30 = vector.broadcast %29 : vector<1x96xf32> to vector<32x96xf32>
    %31 = arith.addf %28, %30 : vector<32x96xf32>
    %32 = vector.extract_strided_slice %31 {offsets = [0, 0], sizes = [32, 32], strides = [1, 1]} : vector<32x96xf32> to vector<32x32xf32>
    %cst_15 = arith.constant 0.353553385 : f32
    %33 = vector.broadcast %cst_15 : f32 to vector<32x32xf32>
    %34 = arith.mulf %32, %33 : vector<32x32xf32>
    %35 = arith.truncf %34 : vector<32x32xf32> to vector<32x32xbf16>
    %36 = vector.shape_cast %35 : vector<32x32xbf16> to vector<32x4x8xbf16>
    %37 = vector.extract_strided_slice %31 {offsets = [0, 32], sizes = [32, 32], strides = [1, 1]} : vector<32x96xf32> to vector<32x32xf32>
    %38 = arith.truncf %37 : vector<32x32xf32> to vector<32x32xbf16>
    %39 = vector.shape_cast %38 : vector<32x32xbf16> to vector<32x4x8xbf16>
    %40 = vector.extract_strided_slice %31 {offsets = [0, 64], sizes = [32, 32], strides = [1, 1]} : vector<32x96xf32> to vector<32x32xf32>
    %41 = arith.truncf %40 : vector<32x32xf32> to vector<32x32xbf16>
    %42 = vector.shape_cast %41 : vector<32x32xbf16> to vector<32x4x8xbf16>
    %cst_16 = arith.constant 0xFF800000 : f32
    %43 = vector.broadcast %cst_16 : f32 to vector<4x32x1xf32>
    %cst_17 = arith.constant 0.000000e+00 : f32
    %44 = vector.broadcast %cst_17 : f32 to vector<4x32x1xf32>
    %cst_18 = arith.constant 0.000000e+00 : f32
    %45 = vector.broadcast %cst_18 : f32 to vector<4x32x8xf32>
    %cst_19 = arith.constant dense<0.000000e+00> : vector<4x32x32xf32>
    %46 = tpu.matmul %36, %39, %cst_19 {dimension_numbers = #tpu.dot_dimension_numbers<[2], [2], [0], [0], [0, 1, 0, 0, 1, 0], [1], [1]>} : vector<32x4x8xbf16>, vector<32x4x8xbf16>, vector<4x32x32xf32> -> vector<4x32x32xf32>
    %47 = tpu.iota {dimensions = array<i32: 0>} : vector<32x32xi32>
    %48 = tpu.iota {dimensions = array<i32: 1>} : vector<32x32xi32>
    %49 = arith.cmpi sge, %47, %48 : vector<32x32xi32>
    %50 = vector.shape_cast %49 : vector<32x32xi1> to vector<1x32x32xi1>
    %cst_20 = arith.constant -1.000000e+04 : f32
    %51 = vector.shape_cast %50 : vector<1x32x32xi1> to vector<1x32x32xi1>
    %52 = vector.broadcast %51 : vector<1x32x32xi1> to vector<4x32x32xi1>
    %53 = vector.broadcast %cst_20 : f32 to vector<4x32x32xf32>
    %54 = arith.select %52, %46, %53 : vector<4x32x32xi1>, vector<4x32x32xf32>
    %cst_21 = arith.constant dense<0xFF800000> : vector<4x32xf32>
    %55 = vector.multi_reduction <maximumf>, %54, %cst_21 [2] : vector<4x32x32xf32> to vector<4x32xf32>
    %56 = vector.shape_cast %55 : vector<4x32xf32> to vector<4x32x1xf32>
    %57 = arith.maximumf %43, %56 : vector<4x32x1xf32>
    %58 = arith.subf %43, %57 : vector<4x32x1xf32>
    %59 = math.exp %58 : vector<4x32x1xf32>
    %60 = vector.broadcast %57 : vector<4x32x1xf32> to vector<4x32x32xf32>
    %61 = arith.subf %54, %60 : vector<4x32x32xf32>
    %62 = math.exp %61 : vector<4x32x32xf32>
    %63 = arith.mulf %59, %44 : vector<4x32x1xf32>
    %cst_22 = arith.constant dense<0.000000e+00> : vector<4x32xf32>
    %64 = vector.multi_reduction <add>, %62, %cst_22 [2] : vector<4x32x32xf32> to vector<4x32xf32>
    %65 = vector.shape_cast %64 : vector<4x32xf32> to vector<4x32x1xf32>
    %66 = arith.addf %63, %65 : vector<4x32x1xf32>
    %67 = vector.broadcast %59 : vector<4x32x1xf32> to vector<4x32x8xf32>
    %68 = arith.mulf %67, %45 : vector<4x32x8xf32>
    %69 = arith.truncf %62 : vector<4x32x32xf32> to vector<4x32x32xbf16>
    %cst_23 = arith.constant dense<0.000000e+00> : vector<4x32x8xf32>
    %70 = tpu.matmul %69, %42, %cst_23 {dimension_numbers = #tpu.dot_dimension_numbers<[2], [0], [1], [2], [0, 0, 0, 1, 1, 2], [0], [1]>} : vector<4x32x32xbf16>, vector<32x4x8xbf16>, vector<4x32x8xf32> -> vector<4x32x8xf32>
    %71 = arith.addf %68, %70 : vector<4x32x8xf32>
    %72 = tpu.reciprocal %66 {approx = true} : vector<4x32x1xf32> -> vector<4x32x1xf32>
    %73 = vector.broadcast %72 : vector<4x32x1xf32> to vector<4x32x8xf32>
    %74 = arith.mulf %71, %73 : vector<4x32x8xf32>
    %75 = arith.truncf %74 : vector<4x32x8xf32> to vector<4x32x8xbf16>
    %c0_24 = arith.constant 0 : index
    %c0_25 = arith.constant 0 : index
    %c0_26 = arith.constant 0 : index
    %76 = vector.load %arg6[%c0_24, %c0_25, %c0_26] : memref<4x8x32xbf16, #tpu.memory_space<vmem>>, vector<4x8x32xbf16>
    %cst_27 = arith.constant dense<0.000000e+00> : vector<4x32x32xf32>
    %77 = tpu.matmul %75, %76, %cst_27 {dimension_numbers = #tpu.dot_dimension_numbers<[2], [1], [1], [2], [0, 0, 0, 1, 1, 2], [0], [0]>} : vector<4x32x8xbf16>, vector<4x8x32xbf16>, vector<4x32x32xf32> -> vector<4x32x32xf32>
    %cst_28 = arith.constant dense<0.000000e+00> : vector<32x32xf32>
    %78 = vector.multi_reduction <add>, %77, %cst_28 [0] : vector<4x32x32xf32> to vector<32x32xf32>
    %c0_29 = arith.constant 0 : index
    %c0_30 = arith.constant 0 : index
    %79 = vector.load %arg7[%c0_29, %c0_30] : memref<1x32xf32, #tpu.memory_space<vmem>>, vector<1x32xf32>
    %80 = vector.broadcast %79 : vector<1x32xf32> to vector<32x32xf32>
    %81 = arith.addf %78, %80 : vector<32x32xf32>
    %c0_31 = arith.constant 0 : index
    %c0_32 = arith.constant 0 : index
    %82 = vector.load %arg8[%c0_31, %c0_32] : memref<1x32xf32, #tpu.memory_space<vmem>>, vector<1x32xf32>
    %c0_33 = arith.constant 0 : index
    %c0_34 = arith.constant 0 : index
    %83 = vector.load %arg9[%c0_33, %c0_34] : memref<1x32xf32, #tpu.memory_space<vmem>>, vector<1x32xf32>
    %cst_35 = arith.constant dense<0.000000e+00> : vector<32xf32>
    %84 = vector.multi_reduction <add>, %81, %cst_35 [1] : vector<32x32xf32> to vector<32xf32>
    %85 = vector.shape_cast %84 : vector<32xf32> to vector<32x1xf32>
    %cst_36 = arith.constant 3.200000e+01 : f32
    %86 = vector.broadcast %cst_36 : f32 to vector<32x1xf32>
    %87 = arith.divf %85, %86 : vector<32x1xf32>
    %88 = vector.broadcast %87 : vector<32x1xf32> to vector<32x32xf32>
    %89 = arith.subf %81, %88 : vector<32x32xf32>
    %90 = arith.mulf %89, %89 : vector<32x32xf32>
    %cst_37 = arith.constant dense<0.000000e+00> : vector<32xf32>
    %91 = vector.multi_reduction <add>, %90, %cst_37 [1] : vector<32x32xf32> to vector<32xf32>
    %92 = vector.shape_cast %91 : vector<32xf32> to vector<32x1xf32>
    %cst_38 = arith.constant 3.200000e+01 : f32
    %93 = vector.broadcast %cst_38 : f32 to vector<32x1xf32>
    %94 = arith.divf %92, %93 : vector<32x1xf32>
    %95 = vector.broadcast %87 : vector<32x1xf32> to vector<32x32xf32>
    %96 = arith.subf %81, %95 : vector<32x32xf32>
    %cst_39 = arith.constant 9.99999974E-6 : f32
    %97 = vector.broadcast %cst_39 : f32 to vector<32x1xf32>
    %98 = arith.addf %94, %97 : vector<32x1xf32>
    %99 = math.rsqrt %98 : vector<32x1xf32>
    %100 = vector.broadcast %99 : vector<32x1xf32> to vector<32x32xf32>
    %101 = arith.mulf %96, %100 : vector<32x32xf32>
    %102 = vector.broadcast %82 : vector<1x32xf32> to vector<32x32xf32>
    %103 = arith.mulf %101, %102 : vector<32x32xf32>
    %104 = vector.broadcast %83 : vector<1x32xf32> to vector<32x32xf32>
    %105 = arith.addf %103, %104 : vector<32x32xf32>
    %106 = arith.addf %1, %105 : vector<32x32xf32>
    %c0_40 = arith.constant 0 : index
    %c0_41 = arith.constant 0 : index
    %107 = vector.load %arg10[%c0_40, %c0_41] : memref<1x32xf32, #tpu.memory_space<vmem>>, vector<1x32xf32>
    %c0_42 = arith.constant 0 : index
    %c0_43 = arith.constant 0 : index
    %108 = vector.load %arg11[%c0_42, %c0_43] : memref<1x32xf32, #tpu.memory_space<vmem>>, vector<1x32xf32>
    %cst_44 = arith.constant dense<0.000000e+00> : vector<32xf32>
    %109 = vector.multi_reduction <add>, %106, %cst_44 [1] : vector<32x32xf32> to vector<32xf32>
    %110 = vector.shape_cast %109 : vector<32xf32> to vector<32x1xf32>
    %cst_45 = arith.constant 3.200000e+01 : f32
    %111 = vector.broadcast %cst_45 : f32 to vector<32x1xf32>
    %112 = arith.divf %110, %111 : vector<32x1xf32>
    %113 = vector.broadcast %112 : vector<32x1xf32> to vector<32x32xf32>
    %114 = arith.subf %106, %113 : vector<32x32xf32>
    %115 = arith.mulf %114, %114 : vector<32x32xf32>
    %cst_46 = arith.constant dense<0.000000e+00> : vector<32xf32>
    %116 = vector.multi_reduction <add>, %115, %cst_46 [1] : vector<32x32xf32> to vector<32xf32>
    %117 = vector.shape_cast %116 : vector<32xf32> to vector<32x1xf32>
    %cst_47 = arith.constant 3.200000e+01 : f32
    %118 = vector.broadcast %cst_47 : f32 to vector<32x1xf32>
    %119 = arith.divf %117, %118 : vector<32x1xf32>
    %120 = vector.broadcast %112 : vector<32x1xf32> to vector<32x32xf32>
    %121 = arith.subf %106, %120 : vector<32x32xf32>
    %cst_48 = arith.constant 9.99999974E-6 : f32
    %122 = vector.broadcast %cst_48 : f32 to vector<32x1xf32>
    %123 = arith.addf %119, %122 : vector<32x1xf32>
    %124 = math.rsqrt %123 : vector<32x1xf32>
    %125 = vector.broadcast %124 : vector<32x1xf32> to vector<32x32xf32>
    %126 = arith.mulf %121, %125 : vector<32x32xf32>
    %127 = vector.broadcast %107 : vector<1x32xf32> to vector<32x32xf32>
    %128 = arith.mulf %126, %127 : vector<32x32xf32>
    %129 = vector.broadcast %108 : vector<1x32xf32> to vector<32x32xf32>
    %130 = arith.addf %128, %129 : vector<32x32xf32>
    %131 = arith.truncf %130 : vector<32x32xf32> to vector<32x32xbf16>
    %c0_49 = arith.constant 0 : index
    %c0_50 = arith.constant 0 : index
    %132 = vector.load %arg12[%c0_49, %c0_50] : memref<32x128xbf16, #tpu.memory_space<vmem>>, vector<32x128xbf16>
    %cst_51 = arith.constant dense<0.000000e+00> : vector<32x128xf32>
    %133 = tpu.matmul %131, %132, %cst_51 {dimension_numbers = #tpu.dot_dimension_numbers<[1], [0], [0], [1], [0, 0, 1, 1], [], []>} : vector<32x32xbf16>, vector<32x128xbf16>, vector<32x128xf32> -> vector<32x128xf32>
    %c0_52 = arith.constant 0 : index
    %c0_53 = arith.constant 0 : index
    %134 = vector.load %arg13[%c0_52, %c0_53] : memref<1x128xf32, #tpu.memory_space<vmem>>, vector<1x128xf32>
    %135 = vector.broadcast %134 : vector<1x128xf32> to vector<32x128xf32>
    %136 = arith.addf %133, %135 : vector<32x128xf32>
    %cst_54 = arith.constant 5.000000e-01 : f32
    %137 = vector.broadcast %cst_54 : f32 to vector<32x128xf32>
    %138 = arith.mulf %137, %136 : vector<32x128xf32>
    %cst_55 = arith.constant 0.797884583 : f32
    %139 = vector.broadcast %cst_55 : f32 to vector<32x128xf32>
    %140 = arith.mulf %139, %136 : vector<32x128xf32>
    %cst_56 = arith.constant 4.471500e-02 : f32
    %141 = vector.broadcast %cst_56 : f32 to vector<32x128xf32>
    %142 = arith.mulf %141, %136 : vector<32x128xf32>
    %143 = arith.mulf %142, %136 : vector<32x128xf32>
    %cst_57 = arith.constant 1.000000e+00 : f32
    %144 = vector.broadcast %cst_57 : f32 to vector<32x128xf32>
    %145 = arith.addf %144, %143 : vector<32x128xf32>
    %146 = arith.mulf %140, %145 : vector<32x128xf32>
    %147 = math.tanh %146 : vector<32x128xf32>
    %cst_58 = arith.constant 1.000000e+00 : f32
    %148 = vector.broadcast %cst_58 : f32 to vector<32x128xf32>
    %149 = arith.addf %148, %147 : vector<32x128xf32>
    %150 = arith.mulf %138, %149 : vector<32x128xf32>
    %151 = arith.truncf %150 : vector<32x128xf32> to vector<32x128xbf16>
    %c0_59 = arith.constant 0 : index
    %c0_60 = arith.constant 0 : index
    %152 = vector.load %arg14[%c0_59, %c0_60] : memref<128x32xbf16, #tpu.memory_space<vmem>>, vector<128x32xbf16>
    %cst_61 = arith.constant dense<0.000000e+00> : vector<32x32xf32>
    %153 = tpu.matmul %151, %152, %cst_61 {dimension_numbers = #tpu.dot_dimension_numbers<[1], [0], [0], [1], [0, 0, 1, 1], [], []>} : vector<32x128xbf16>, vector<128x32xbf16>, vector<32x32xf32> -> vector<32x32xf32>
    %c0_62 = arith.constant 0 : index
    %c0_63 = arith.constant 0 : index
    %154 = vector.load %arg15[%c0_62, %c0_63] : memref<1x32xf32, #tpu.memory_space<vmem>>, vector<1x32xf32>
    %155 = vector.broadcast %154 : vector<1x32xf32> to vector<32x32xf32>
    %156 = arith.addf %153, %155 : vector<32x32xf32>
    %c0_64 = arith.constant 0 : index
    %c0_65 = arith.constant 0 : index
    %157 = vector.load %arg16[%c0_64, %c0_65] : memref<1x32xf32, #tpu.memory_space<vmem>>, vector<1x32xf32>
    %c0_66 = arith.constant 0 : index
    %c0_67 = arith.constant 0 : index
    %158 = vector.load %arg17[%c0_66, %c0_67] : memref<1x32xf32, #tpu.memory_space<vmem>>, vector<1x32xf32>
    %cst_68 = arith.constant dense<0.000000e+00> : vector<32xf32>
    %159 = vector.multi_reduction <add>, %156, %cst_68 [1] : vector<32x32xf32> to vector<32xf32>
    %160 = vector.shape_cast %159 : vector<32xf32> to vector<32x1xf32>
    %cst_69 = arith.constant 3.200000e+01 : f32
    %161 = vector.broadcast %cst_69 : f32 to vector<32x1xf32>
    %162 = arith.divf %160, %161 : vector<32x1xf32>
    %163 = vector.broadcast %162 : vector<32x1xf32> to vector<32x32xf32>
    %164 = arith.subf %156, %163 : vector<32x32xf32>
    %165 = arith.mulf %164, %164 : vector<32x32xf32>
    %cst_70 = arith.constant dense<0.000000e+00> : vector<32xf32>
    %166 = vector.multi_reduction <add>, %165, %cst_70 [1] : vector<32x32xf32> to vector<32xf32>
    %167 = vector.shape_cast %166 : vector<32xf32> to vector<32x1xf32>
    %cst_71 = arith.constant 3.200000e+01 : f32
    %168 = vector.broadcast %cst_71 : f32 to vector<32x1xf32>
    %169 = arith.divf %167, %168 : vector<32x1xf32>
    %170 = vector.broadcast %162 : vector<32x1xf32> to vector<32x32xf32>
    %171 = arith.subf %156, %170 : vector<32x32xf32>
    %cst_72 = arith.constant 9.99999974E-6 : f32
    %172 = vector.broadcast %cst_72 : f32 to vector<32x1xf32>
    %173 = arith.addf %169, %172 : vector<32x1xf32>
    %174 = math.rsqrt %173 : vector<32x1xf32>
    %175 = vector.broadcast %174 : vector<32x1xf32> to vector<32x32xf32>
    %176 = arith.mulf %171, %175 : vector<32x32xf32>
    %177 = vector.broadcast %157 : vector<1x32xf32> to vector<32x32xf32>
    %178 = arith.mulf %176, %177 : vector<32x32xf32>
    %179 = vector.broadcast %158 : vector<1x32xf32> to vector<32x32xf32>
    %180 = arith.addf %178, %179 : vector<32x32xf32>
    %181 = arith.addf %106, %180 : vector<32x32xf32>
    %c0_73 = arith.constant 0 : index
    %c0_74 = arith.constant 0 : index
    %c0_75 = arith.constant 0 : index
    %182 = vector.load %arg18[%c0_73, %c0_74, %c0_75] : memref<1x32x32xf32, #tpu.memory_space<vmem>>, vector<1x32x32xf32>
    %183 = vector.shape_cast %182 : vector<1x32x32xf32> to vector<32x32xf32>
    %184 = vector.shape_cast %181 : vector<32x32xf32> to vector<1x32x32xf32>
    tpu.vector_store %arg18[%c0_73, %c0_74, %c0_75], %184 {strides = array<i32>} : memref<1x32x32xf32, #tpu.memory_space<vmem>>, vector<1x32x32xf32>,
    return
  }
  func.func @transform_0(%arg0: i32) -> (i32, i32, i32) {
    %c0_i32 = arith.constant 0 : i32
    %c0_i32_0 = arith.constant 0 : i32
    %c0_i32_1 = arith.constant 0 : i32
    return %arg0, %c0_i32, %c0_i32_0 : i32, i32, i32
  }
  func.func @transform_1(%arg0: i32) -> (i32, i32) {
    %c0_i32 = arith.constant 0 : i32
    %c0_i32_0 = arith.constant 0 : i32
    %c0_i32_1 = arith.constant 0 : i32
    return %c0_i32, %c0_i32_0 : i32, i32
  }
  func.func @transform_2(%arg0: i32) -> (i32, i32) {
    %c0_i32 = arith.constant 0 : i32
    %c0_i32_0 = arith.constant 0 : i32
    %c0_i32_1 = arith.constant 0 : i32
    return %c0_i32, %c0_i32_0 : i32, i32
  }
  func.func @transform_3(%arg0: i32) -> (i32, i32) {
    %c0_i32 = arith.constant 0 : i32
    %c0_i32_0 = arith.constant 0 : i32
    %c0_i32_1 = arith.constant 0 : i32
    return %c0_i32, %c0_i32_0 : i32, i32
  }
  func.func @transform_4(%arg0: i32) -> (i32, i32) {
    %c0_i32 = arith.constant 0 : i32
    %c0_i32_0 = arith.constant 0 : i32
    %c0_i32_1 = arith.constant 0 : i32
    return %c0_i32, %c0_i32_0 : i32, i32
  }
  func.func @transform_5(%arg0: i32) -> (i32, i32, i32) {
    %c0_i32 = arith.constant 0 : i32
    %c0_i32_0 = arith.constant 0 : i32
    %c0_i32_1 = arith.constant 0 : i32
    %c0_i32_2 = arith.constant 0 : i32
    return %c0_i32, %c0_i32_0, %c0_i32_1 : i32, i32, i32
  }
  func.func @transform_6(%arg0: i32) -> (i32, i32) {
    %c0_i32 = arith.constant 0 : i32
    %c0_i32_0 = arith.constant 0 : i32
    %c0_i32_1 = arith.constant 0 : i32
    return %c0_i32, %c0_i32_0 : i32, i32
  }
  func.func @transform_7(%arg0: i32) -> (i32, i32) {
    %c0_i32 = arith.constant 0 : i32
    %c0_i32_0 = arith.constant 0 : i32
    %c0_i32_1 = arith.constant 0 : i32
    return %c0_i32, %c0_i32_0 : i32, i32
  }
  func.func @transform_8(%arg0: i32) -> (i32, i32) {
    %c0_i32 = arith.constant 0 : i32
    %c0_i32_0 = arith.constant 0 : i32
    %c0_i32_1 = arith.constant 0 : i32
    return %c0_i32, %c0_i32_0 : i32, i32
  }
  func.func @transform_9(%arg0: i32) -> (i32, i32) {
    %c0_i32 = arith.constant 0 : i32
    %c0_i32_0 = arith.constant 0 : i32
    %c0_i32_1 = arith.constant 0 : i32
    return %c0_i32, %c0_i32_0 : i32, i32
  }
  func.func @transform_10(%arg0: i32) -> (i32, i32) {
    %c0_i32 = arith.constant 0 : i32
    %c0_i32_0 = arith.constant 0 : i32
    %c0_i32_1 = arith.constant 0 : i32
    return %c0_i32, %c0_i32_0 : i32, i32
  }
  func.func @transform_11(%arg0: i32) -> (i32, i32) {
    %c0_i32 = arith.constant 0 : i32
    %c0_i32_0 = arith.constant 0 : i32
    %c0_i32_1 = arith.constant 0 : i32
    return %c0_i32, %c0_i32_0 : i32, i32
  }
  func.func @transform_12(%arg0: i32) -> (i32, i32) {
    %c0_i32 = arith.constant 0 : i32
    %c0_i32_0 = arith.constant 0 : i32
    %c0_i32_1 = arith.constant 0 : i32
    return %c0_i32, %c0_i32_0 : i32, i32
  }
  func.func @transform_13(%arg0: i32) -> (i32, i32) {
    %c0_i32 = arith.constant 0 : i32
    %c0_i32_0 = arith.constant 0 : i32
    %c0_i32_1 = arith.constant 0 : i32
    return %c0_i32, %c0_i32_0 : i32, i32
  }
  func.func @transform_14(%arg0: i32) -> (i32, i32) {
    %c0_i32 = arith.constant 0 : i32
    %c0_i32_0 = arith.constant 0 : i32
    %c0_i32_1 = arith.constant 0 : i32
    return %c0_i32, %c0_i32_0 : i32, i32
  }
  func.func @transform_15(%arg0: i32) -> (i32, i32) {
    %c0_i32 = arith.constant 0 : i32
    %c0_i32_0 = arith.constant 0 : i32
    %c0_i32_1 = arith.constant 0 : i32
    return %c0_i32, %c0_i32_0 : i32, i32
  }
  func.func @transform_16(%arg0: i32) -> (i32, i32) {
    %c0_i32 = arith.constant 0 : i32
    %c0_i32_0 = arith.constant 0 : i32
    %c0_i32_1 = arith.constant 0 : i32
    return %c0_i32, %c0_i32_0 : i32, i32
  }
  func.func @transform_17(%arg0: i32) -> (i32, i32, i32) {
    %c0_i32 = arith.constant 0 : i32
    %c0_i32_0 = arith.constant 0 : i32
    %c0_i32_1 = arith.constant 0 : i32
    return %arg0, %c0_i32, %c0_i32_0 : i32, i32, i32
  }
}

</mosaic_0001>

<bundles_post_ra>
// kernel: tpu_custom_call.1
= control target key start
LH: loop header
LB: loop body
LE: loop exit
PB: predicated region body
PF: predicated region fallthrough
CT: control target
= control target key end

     0   :  { %6 = vsyncpa [#allocation3], 0  ;;  %s453_s0 = inlined_call_operand.hbm [shape: f32[8,128], index: 0, kind: input, shape index: {}]   ;;  %s454_s1 = inlined_call_operand.hbm [shape: f32[16,128], index: 1, kind: output, shape index: {}]  }
   0x1   :  { %7 = vsyncpa [#allocation4], 0 }
   0x2   :  { %9 = vsyncpa [#allocation4 + $0x1], 0  ;;  %s347_s6 = smov 0   ;;  %s349_s7 = smov 0  }
   0x3   :  { %s351_s8 = smov 0   ;;  %s353_s9 = smov 0  }
   0x4 LB: > { %s368_s10 = sadd.s32 4294967295, %s333_s9   ;;  %s183_s11 = sadd.s32 4294967294, %s333_s9   ;;  %s333_s9 = sphi %s353_s9, %s462_s9   ;;  %s329_s8 = sphi %s351_s8, %s461_s8   ;;  %s325_s7 = sphi %s349_s7, %s460_s7   ;;  %s321_s6 = sphi %s347_s6, %s459_s6  }
   0x5   : > { %s372_s12 = sadd.s32 1, %s333_s9   ;;  %s43_s13 = sadd.s32 1, %s329_s8 }
   0x6   : > { %s40_s14 = ssub.s32 %s333_s9, %s372_s12  ;;  %p53_p0 = scmp.ne.s32.totalorder %s329_s8, %s325_s7 }
   0x7   : > { %p41_p1 = scmp.eq.s32.totalorder %s40_s14, 0  ;;  %p54_p2 = scmp.eq.s32.totalorder %s368_s10, 1 }
   0x8   : > { %p59_p3 = scmp.ne.s32.totalorder %s325_s7, %s321_s6  ;;  %p60_p4 = scmp.eq.s32.totalorder %s183_s11, 1 }
   0x9   : > { %s383_s15 = scalar_select %p41_p1, %s329_s8, %s43_s13  }
   0xa   : > { %p385_p5 = por %p54_p2, %p53_p0  ;;  %p389_p6 = por %p60_p4, %p59_p3 }
   0xb   : > { %p184_p7 = scmp.ge.s32.totalorder %s333_s9, 1  ;;  %p67_p8 = scmp.lt.s32.totalorder %s333_s9, 3 }
   0xc   : > { %s456_s17 = scalar_select %p389_p6, 1, 0 }
   0xd   : > { %p207_p9 = scmp.eq.s32.totalorder %s368_s10, 0  ;;  %p396_p10 = pnand %p184_p7, %p67_p8 }
   0xe   : > { %s335_s19 = smov [#allocation2]  }
   0xf   : > { %s80_s20 = sshll.u32 %s335_s19, 4  ;;  %p199_p11 = pneg %p396_p10  ;;  %s81_s20 = int_to_ptr.vmem [resolvable:$true] %s80_s20 }
  0x10   : > { %s254_s21 = scalar_lea.vmem %s81_s20, 128  ;;  %p262_p3 = scmp.lt.s32.totalorder %s81_s20, %s81_s20 }
  0x11   : > { %p200_p12 = pnand %p207_p9, %p199_p11  ;;  %p255_p0 = scmp.ne.s32.totalorder %s81_s20, %s254_s21 }
  0x12   : > { %p263_p4 = scmp.lt.s32.totalorder %s254_s21, %s254_s21 }
  0x13   : > { %p245_p13 = pneg %p200_p12 }
  0x14   : > { %p264_p6 = por %p263_p4, %p262_p3 }
  0x15   : > { %p257_p1 = pnand %p255_p0, %p245_p13 }
  0x17   : > { %p258_p2 = pneg %p257_p1 }
  0x19   : > { %p265_p7 = pnand %p264_p6, %p258_p2 }
  0x1b   : > { %268 = shalt.err (!%p265_p7)
}
  0x1c   : > { %202 = dma.hbm_to_vmem [thread:$0]  (!%p200_p12), %s453_s0, 128, %s81_s20, [#allocation3]  }
  0x1d   : > { %93 = sbr.rel (%p396_p10) target bundleno = 60 (0x3c), region = 24 }
  0x22   : > { %312 = dma.done.wait (%p207_p9), [#allocation3], 128  }
  0x23   : > { %314 = vsyncadd (%p207_p9), [#allocation3], 4294967168  ;;  %s105_s24 = sand.u32 1, %s325_s7   ;;  %s190_s28 = sshll.u32 %s368_s10, 7  ;;  %v108_v0 = vld [vmem:[#allocation2] sm:$0xff] }
  0x24   : > { %s188_s25 = sshll.u32 %s105_s24, 3  ;;  %s122_s2 = scalar_lea.hbm %s454_s1, %s190_s28 }
  0x25   : > { %s107_s26 = scalar_lea.vmem [#allocation5], %s188_s25  ;;  %s111_s3 = scalar_lea.sflag [#allocation4], %s105_s24 }
  0x26   : > { %s124_s27 = sshll.u32 %s107_s26, 4  ;;  %109 = vst [vmem:[%s107_s26] sm:$0xff] %v108_v0  ;;  %s336_s5 = smov [#allocation5]   ;;  %s415_s27 = int_to_ptr.vmem [resolvable:$true] %s124_s27 }
  0x27   : > { %s269_s4 = scalar_lea.vmem %s415_s27, 128  ;;  %s273_s11 = sshll.u32 %s336_s5, 4  ;;  %s274_s11 = int_to_ptr.vmem [resolvable:$false] %s273_s11 }
  0x28   : > { %p270_p6 = scmp.ne.s32.totalorder %s415_s27, %s269_s4  ;;  %s275_s10 = scalar_lea.vmem %s274_s11, 256 }
  0x29   : > { %p276_p10 = scmp.lt.s32.totalorder %s415_s27, %s274_s11  ;;  %p277_p11 = scmp.lt.s32.totalorder %s275_s10, %s269_s4 }
  0x2a   : > { %p271_p8 = pnand %p270_p6, %p385_p5 }
  0x2b   : > { %p278_p12 = por %p277_p11, %p276_p10 }
  0x2c   : > { %p272_p9 = pneg %p271_p8 }
  0x2e   : > { %p279_p13 = pnand %p278_p12, %p272_p9 }
  0x30   : > { %282 = shalt.err (!%p279_p13)
}
  0x31   : > { %s283_s13 = scalar_lea.hbm %s122_s2, 128  ;;  %s287_s19 = scalar_lea.hbm %s454_s1, 256 }
  0x32   : > { %p284_p0 = scmp.ne.s32.totalorder %s122_s2, %s283_s13  ;;  %p288_p3 = scmp.lt.s32.totalorder %s122_s2, %s454_s1 }
  0x33   : > { %p289_p4 = scmp.lt.s32.totalorder %s287_s19, %s283_s13 }
  0x34   : > { %p285_p1 = pnand %p284_p0, %p385_p5 }
  0x35   : > { %p290_p7 = por %p289_p4, %p288_p3 }
  0x36   : > { %p286_p2 = pneg %p285_p1 }
  0x38   : > { %p291_p6 = pnand %p290_p7, %p286_p2 }
  0x3a   : > { %294 = shalt.err (!%p291_p6)
}
  0x3b   : > { %197 = dma.vmem_to_hbm [thread:$0]  (%p385_p5), %s415_s27, 128, %s122_s2, %s111_s3  }
  0x3c PF: > { %p209_p8 = scmp.ge.s32.totalorder %s333_s9, 2  ;;  %s136_s22 = sand.u32 1, %s321_s6  }
  0x3d   : > { %p458_p9 = scmp.ne.s32.totalorder %s456_s17, 0  ;;  %s137_s23 = scalar_lea.sflag [#allocation4], %s136_s22 }
  0x3f   : > { %p204_p10 = pnand %p209_p8, %p458_p9 }
  0x41   : > { %p205_p11 = pneg %p204_p10 }
  0x43   : > { %316 = dma.done.wait (%p205_p11), %s137_s23, 128  }
  0x44   : > { %318 = vsyncadd (%p205_p11), %s137_s23, 4294967168  ;;  %p12_p12 = scmp.ge.s32.totalorder %s372_s12, 4   ;;  %s459_s6 = smov %s325_s7 }
  0x45   : > { %s460_s7 = smov %s329_s8  ;;  %s461_s8 = smov %s383_s15 }
  0x46   : > { %s462_s9 = smov %s372_s12  ;;  %14 = sbr.rel (!%p12_p12) target bundleno = 4 (0x4), region = 61 }
  0x4b   :  { %142 = vsyncpa [#allocation3], 1 }
  0x4c   :  { %144 = vsyncpa [#allocation3 + $0x1], 1 }
  0x4d   :  { %145 = vsyncpa [#allocation4], 1 }
  0x4e   :  { %147 = vsyncpa [#allocation4 + $0x1], 1 }

// kernel: make_a_scene_forward.5
= control target key start
LH: loop header
LB: loop body
LE: loop exit
PB: predicated region body
PF: predicated region fallthrough
CT: control target
= control target key end

     0   :  { %12 = vsyncpa [#allocation3], 0  ;;  %s1092_s0 = inlined_call_operand.vmem [shape: f32[2,16,32], index: 0, kind: input, shape index: {}]   ;;  %s1093_s1 = inlined_call_operand.vmem [shape: f32[1,32], index: 1, kind: input, shape index: {}]   ;;  %s1094_s2 = inlined_call_operand.vmem [shape: f32[1,32], index: 2, kind: input, shape index: {}]   ;;  %s1095_s3 = inlined_call_operand.vmem [shape: f32[1,32], index: 3, kind: input, shape index: {}]   ;;  %s1096_s4 = inlined_call_operand.vmem [shape: f32[1,32], index: 4, kind: input, shape index: {}]   ;;  %s1097_s5 = inlined_call_operand.vmem [shape: bf16[32,384], index: 5, kind: input, shape index: {}]   ;;  %s1098_s6 = inlined_call_operand.vmem [shape: f32[1,384], index: 6, kind: input, shape index: {}]   ;;  %s1099_s7 = inlined_call_operand.hbm [shape: f32[2,16,384], index: 7, kind: output, shape index: {}]  }
   0x1   :  { %14 = vsyncpa [#allocation3 + $0x1], 0  ;;  %s931_s24 = smov 0   ;;  %s933_s25 = smov 0  }
   0x2   :  { %s935_s26 = smov 0   ;;  %s937_s27 = smov 0  }
   0x3   :  { %s939_s28 = smov 0   ;;  %s941_s29 = smov 0  }
   0x4 LB: > { %s693_s30 = sadd.s32 4294967295, %s883_s29   ;;  %s694_s8 = sadd.s32 4294967294, %s883_s29   ;;  %s883_s29 = sphi %s941_s29, %s20_s29   ;;  %s879_s28 = sphi %s939_s28, %s1106_s28   ;;  %s875_s27 = sphi %s937_s27, %s1105_s27   ;;  %s871_s26 = sphi %s935_s26, %s1104_s26   ;;  %s867_s25 = sphi %s933_s25, %s1103_s25   ;;  %s863_s24 = sphi %s931_s24, %s1102_s24  }
   0x5   : > { %s32_s9 = sadd.s32 1, %s879_s28  ;;  %s203_s10 = sadd.s32 1, %s871_s26 }
   0x6   : > { %p34_p0 = scmp.ge.s32.totalorder %s32_s9, 2  ;;  %p213_p1 = scmp.ne.s32.totalorder %s871_s26, %s867_s25 }
   0x7   : > { %p214_p2 = scmp.eq.s32.totalorder %s693_s30, 1  ;;  %p219_p3 = scmp.ne.s32.totalorder %s867_s25, %s863_s24 }
   0x8   : > { %s1108_s9 = smov (%p34_p0, %s32_s9), 0  ;;  %p220_p5 = scmp.eq.s32.totalorder %s694_s8, 1 }
   0x9   : > { %p971_p4 = por %p214_p2, %p213_p1  ;;  %s198_s12 = ssub.s32 %s879_s28, %s1108_s9 }
   0xa   : > { %p699_p6 = scmp.ge.s32.totalorder %s883_s29, 1  ;;  %p201_p7 = scmp.eq.s32.totalorder %s198_s12, 0 }
   0xb   : > { %p978_p8 = por %p220_p5, %p219_p3  ;;  %p275_p9 = scmp.lt.s32.totalorder %s883_s29, 3 }
   0xc   : > { %s984_s14 = scalar_select %p201_p7, %s871_s26, %s203_s10  }
   0xd   : > { %p276_p10 = pnand %p699_p6, %p275_p9 }
   0xe   : > { %p316_p11 = scmp.lt.s32.totalorder (!%p276_p10), %s875_s27, 1  ;;  %s313_s12 = sand.u32 (!%p276_p10), 1, %s867_s25  }
   0xf   : > { %279 = sbr.rel (%p276_p10) target bundleno = 862 (0x35e), region = 48  ;;  %s1047_s23 = scalar_lea.sflag (!%p276_p10), [#allocation3], %s313_s12 }
  0x10   : > { %s729_s17 = smul.u32 (!%p276_p10), 48, %s313_s12  ;;  %s888_s8 = smov (!%p276_p10), [#allocation2]  }
  0x11   : > { %s730_s18 = smul.u32 (!%p276_p10), 768, %s875_s27  ;;  %s811_s10 = sshll.u32 (!%p276_p10), %s888_s8, 4  ;;  %s812_s10 = int_to_ptr.vmem [resolvable:$false] %s811_s10 }
  0x13   : > { %s1043_s22 = scalar_lea.hbm (!%p276_p10), %s1099_s7, %s730_s18 }
  0x14   : > { %s317_s15 = scalar_select %p316_p11, %s875_s27, 1  ;;  %vm338_vm0 = vcmask 261120   ;;  %v702_v21 = vld [vmem:[%s1093_s1] ss:$0 sm:$0xff]  ;;  %v791_v42 = vld [vmem:[%s1097_s5 + $0x1c] ss:$12 sps:$4 sm:$0xff]  }
  0x15   : > { %v703_v23 = vld [vmem:[%s1094_s2] ss:$0 sm:$0xff]  ;;  %v793_v43 = vld [vmem:[%s1097_s5 + $0x18] ss:$12 sps:$4 sm:$0xff]   ;;  %v885_v44 = vmov 0.0   ;;  %v886_v47 = vmov 0   ;;  %499 = vmatprep.subr.bf16.mxu0 %v791_v42 }
  0x16   : > { %s717_s16 = sshll.u32 %s317_s15, 4  ;;  %721 = vmatprep.subr.bf16.mxu1 %v885_v44  ;;  %v794_v45 = vld [vmem:[%s1097_s5 + $0x20] ss:$12 sps:$4 sm:$0xff]   ;;  %v795_v46 = vld [vmem:[%s1097_s5 + $0x4] ss:$12 sps:$4 sm:$0xff]   ;;  %519 = vmatprep.mubr.bf16.mxu0 %v886_v47  ;;  %vm887_vm1 = vmmov 0  }
  0x17   : > { %s320_s19 = scalar_lea.vmem %s1092_s0, %s717_s16  ;;  %500 = vmatpush1.bf16.msra.mxu0 %v793_v43  ;;  %722 = vmatpush3.bf16.msra.mxu1 %v794_v45  ;;  %v797_v48 = vld [vmem:[%s1097_s5] ss:$12 sps:$4 sm:$0xff]   ;;  %v798_v49 = vld [vmem:[%s1097_s5 + $0x8] ss:$12 sps:$4 sm:$0xff]   ;;  %s813_s15 = scalar_lea.vmem %s812_s10, 1536 }
  0x18   : > { %v334_v0 = vld [vmem:[%s320_s19] sm:$0xff]  ;;  %v335_v1 = vld [vmem:[%s320_s19 + $0x8] sm:$0xff]  ;;  %501 = vmatprep.subr.bf16.mxu0 %v795_v46  ;;  %723 = vmatprep.subr.bf16.mxu1 %v885_v44  ;;  %s315_s19 = scalar_lea.vmem [#allocation2], %s729_s17 }
  0x19   : > { %v339_v2 = vsel %vm338_vm0, %v334_v0, 0.0  ;;  %v342_v3 = vsel %vm338_vm0, %v335_v1, 0.0  ;;  %725 = vmatprep.mubr.msk.bf16.mxu1 %vm887_vm1, %v885_v44  ;;  %v704_v58 = vld [vmem:[%s1095_s3] ss:$0 sm:$0xff]  ;;  %s593_s20 = sshll.u32 %s315_s19, 4  ;;  %s1038_s20 = int_to_ptr.vmem [resolvable:$true] %s593_s20 }
  0x1a   : > { %340 = vadd.xlane.f32.xlu0 %v339_v2  ;;  %v705_v62 = vld [vmem:[%s1096_s4] ss:$0 sm:$0xff]  ;;  %s807_s30 = scalar_lea.vmem %s1038_s20, 768  ;;  %p814_p1 = scmp.lt.s32.totalorder %s1038_s20, %s812_s10 }
  0x1b   : > { %502 = vmatpush1.bf16.msra.mxu0 %v797_v48  ;;  %724 = vmatpush3.bf16.msra.mxu1 %v798_v49  ;;  %p808_p12 = scmp.ne.s32.totalorder %s1038_s20, %s807_s30  ;;  %p815_p2 = scmp.lt.s32.totalorder %s813_s15, %s807_s30 }
  0x1d   : > { %p809_p13 = pnand %p808_p12, %p971_p4  ;;  %p816_p3 = por %p815_p2, %p814_p1 }
  0x1e   : > { %343 = vadd.xlane.f32.xlu0 %v342_v3  ;;  %v437_v3 = vlaneseq }
  0x1f   : > { %p810_p0 = pneg %p809_p13 }
  0x21   : > { %p817_p5 = pnand %p816_p3, %p810_p0 }
  0xa3   : > { %v341_v4 = vpop.xlane.xlu0 %340 }
  0xa4   : > { %v346_v5 = vmul.f32 0.03125, %v341_v4  ;;  %v438_v4 = vshrl.u32 %v437_v3, 7 }
  0xa6   : > { %v348_v6 = vsub.f32 %v334_v0, %v346_v5  ;;  %v439_v5 = vsub.s32 0, %v438_v4 }
  0xa7   : > { %v344_v7 = vpop.xlane.xlu0 %343 }
  0xa8   : > { %v347_v8 = vmul.f32 0.03125, %v344_v7  ;;  %v350_v9 = vmul.f32 %v348_v6, %v348_v6  ;;  %v435_v7 = vld [vmem:[%s1098_s6] sm:$0x7] }
  0xaa   : > { %v349_v10 = vsub.f32 %v335_v1, %v347_v8  ;;  %v352_v11 = vsel %vm338_vm0, %v350_v9, 0.0  ;;  %v443_v8 = vsub.s32 1, %v438_v4  ;;  %v440_v9 = vrot.slane %v435_v7, %v439_v5 }
  0xab   : > { %353 = vadd.xlane.f32.xlu1 %v352_v11 }
  0xac   : > { %v351_v12 = vmul.f32 %v349_v10, %v349_v10  ;;  %v444_v11 = vrot.slane %v435_v7, %v443_v8 }
  0xae   : > { %v355_v13 = vsel %vm338_vm0, %v351_v12, 0.0 }
  0xaf   : > { %356 = vadd.xlane.f32.xlu1 %v355_v13 }
 0x134   : > { %v354_v14 = vpop.xlane.xlu1 %353 }
 0x135   : > { %v358_v15 = vmul.f32 0.03125, %v354_v14 }
 0x137   : > { %v360_v16 = vadd.f32 1e-05, %v358_v15 }
 0x138   : > { %v357_v17 = vpop.xlane.xlu1 %356 }
 0x139   : > { %799 = vrsqrt.f32 %v360_v16  ;;  %v359_v18 = vmul.f32 0.03125, %v357_v17 }
 0x13b   : > { %v361_v19 = vadd.f32 1e-05, %v359_v18 }
 0x13d   : > { %801 = vrsqrt.f32 %v361_v19 }
 0x146   : > { %v800_v20 = vpop.eup %799 }
 0x147   : > { %v364_v22 = vmul.f32 %v800_v20, %v348_v6  ;;  %v447_v6 = vsub.s32 2, %v438_v4 }
 0x149   : > { %v372_v24 = vmul.f32 %v702_v21, %v364_v22 }
 0x14a   : > { %v802_v25 = vpop.eup %801 }
 0x14b   : > { %v380_v26 = vadd.f32 %v703_v23, %v372_v24  ;;  %v365_v27 = vmul.f32 %v802_v25, %v349_v10  ;;  %v448_v10 = vrot.slane %v435_v7, %v447_v6 }
 0x14d   : > { %v384_v28 = vsel %vm338_vm0, %v380_v26, 0.0  ;;  %v373_v29 = vmul.f32 %v702_v21, %v365_v27 }
 0x14e   : > { %385 = vadd.xlane.f32.xlu0 %v384_v28 }
 0x14f   : > { %v381_v30 = vadd.f32 %v703_v23, %v373_v29 }
 0x151   : > { %v387_v31 = vsel %vm338_vm0, %v381_v30, 0.0 }
 0x152   : > { %388 = vadd.xlane.f32.xlu1 %v387_v31 }
 0x1d7   : > { %v386_v32 = vpop.xlane.xlu0 %385 }
 0x1d8   : > { %v390_v33 = vmul.f32 0.03125, %v386_v32 }
 0x1da   : > { %v392_v34 = vsub.f32 %v380_v26, %v390_v33 }
 0x1db   : > { %v389_v35 = vpop.xlane.xlu1 %388 }
 0x1dc   : > { %v391_v36 = vmul.f32 0.03125, %v389_v35  ;;  %v394_v37 = vmul.f32 %v392_v34, %v392_v34 }
 0x1de   : > { %v393_v38 = vsub.f32 %v381_v30, %v391_v36  ;;  %v396_v39 = vsel %vm338_vm0, %v394_v37, 0.0 }
 0x1df   : > { %397 = vadd.xlane.f32.xlu0 %v396_v39 }
 0x1e0   : > { %v395_v40 = vmul.f32 %v393_v38, %v393_v38 }
 0x1e2   : > { %v399_v41 = vsel %vm338_vm0, %v395_v40, 0.0 }
 0x1e3   : > { %400 = vadd.xlane.f32.xlu1 %v399_v41 }
 0x268   : > { %v398_v50 = vpop.xlane.xlu0 %397 }
 0x269   : > { %v402_v51 = vmul.f32 0.03125, %v398_v50 }
 0x26b   : > { %v404_v52 = vadd.f32 1e-05, %v402_v51 }
 0x26c   : > { %v401_v53 = vpop.xlane.xlu1 %400 }
 0x26d   : > { %803 = vrsqrt.f32 %v404_v52  ;;  %v403_v54 = vmul.f32 0.03125, %v401_v53 }
 0x26f   : > { %v405_v55 = vadd.f32 1e-05, %v403_v54 }
 0x271   : > { %805 = vrsqrt.f32 %v405_v55 }
 0x27a   : > { %v804_v56 = vpop.eup %803 }
 0x27b   : > { %v408_v57 = vmul.f32 %v804_v56, %v392_v34 }
 0x27d   : > { %v416_v61 = vmul.f32 %v704_v58, %v408_v57 }
 0x27e   : > { %v806_v59 = vpop.eup %805 }
 0x27f   : > { %v409_v60 = vmul.f32 %v806_v59, %v393_v38  ;;  %v424_v0 = vadd.f32 %v705_v62, %v416_v61 }
 0x281   : > { %v417_v63 = vmul.f32 %v704_v58, %v409_v60 }
 0x283   : > { %v425_v1 = vadd.f32 %v705_v62, %v417_v63 }
 0x285   : > { %v426_v2 = vpack.c.bf16 %v425_v1, %v424_v0 }
 0x287   : > { %712 = vmatmul.mubr.msk.bf16.vlgmr.msra.gmra.mxu0 %vm338_vm0, %v426_v2  ;;  %726 = vmatmul.mubr.msk.bf16.vlgmr.msra.gmra.mxu1 %vm338_vm0, %v426_v2 }
 0x347   : > { %v521_v12 = vpop.f32.mrf.mxu0  ;;  %v564_v13 = vpop.f32.mrf.mxu1 }
 0x348   : > { %v522_v14 = vadd.f32 %v521_v12, %v440_v9  ;;  %v565_v15 = vadd.f32 %v564_v13, %v448_v10 }
 0x349   : > { %v523_v16 = vpop.f32.mrf.mxu0  ;;  %v727_v17 = vpop.f32.mrf.mxu1 }
 0x34a   : > { %571 = vst [vmem:[%s315_s19] sm:$0xff] %v522_v14  ;;  %573 = vst [vmem:[%s315_s19 + $0x10] sm:$0xff] %v565_v15  ;;  %v524_v18 = vadd.f32 %v523_v16, %v444_v11 }
 0x34b   : > { %v525_v19 = vpop.f32.mrf.mxu0  ;;  %v567_v20 = vpop.f32.mrf.mxu1 }
 0x34c   : > { %572 = vst [vmem:[%s315_s19 + $0x8] sm:$0xff] %v524_v18  ;;  %v526_v21 = vadd.f32 %v525_v19, %v440_v9  ;;  %v568_v22 = vadd.f32 %v567_v20, %v448_v10 }
 0x34d   : > { %v527_v23 = vpop.f32.mrf.mxu0  ;;  %v728_v24 = vpop.f32.mrf.mxu1 }
 0x34e   : > { %574 = vst [vmem:[%s315_s19 + $0x18] sm:$0xff] %v526_v21  ;;  %576 = vst [vmem:[%s315_s19 + $0x28] sm:$0xff] %v568_v22  ;;  %v528_v25 = vadd.f32 %v527_v23, %v444_v11 }
 0x350   : > { %575 = vst [vmem:[%s315_s19 + $0x20] sm:$0xff] %v528_v25 }
 0x351   : > { %820 = shalt.err (!%p817_p5)
}
 0x352   : > { %s821_s12 = scalar_lea.hbm %s1043_s22, 768  ;;  %s825_s18 = scalar_lea.hbm %s1099_s7, 1536 }
 0x353   : > { %p822_p6 = scmp.ne.s32.totalorder %s1043_s22, %s821_s12  ;;  %p826_p10 = scmp.lt.s32.totalorder %s1043_s22, %s1099_s7 }
 0x354   : > { %p827_p11 = scmp.lt.s32.totalorder %s825_s18, %s821_s12 }
 0x355   : > { %p823_p7 = pnand %p822_p6, %p971_p4 }
 0x356   : > { %p828_p12 = por %p827_p11, %p826_p10 }
 0x357   : > { %p824_p9 = pneg %p823_p7 }
 0x359   : > { %p829_p13 = pnand %p828_p12, %p824_p9 }
 0x35b   : > { %832 = shalt.err (!%p829_p13)
}
 0x35c   : > { %s889_s21 = smov 384   ;;  %s890_s30 = smov 24  }
 0x35d   : > { %731 = dma.vmem_to_hbm [thread:$0]  (%p971_p4), %s1038_s20, 768, %s1043_s22, %s1047_s23, %s889_s21, %s889_s21, %s890_s30  }
 0x35e PF: > { %p737_p0 = scmp.ge.s32.totalorder %s883_s29, 2  ;;  %s608_s8 = sand.u32 1, %s863_s24  }
 0x35f   : > { %s609_s10 = scalar_lea.sflag [#allocation3], %s608_s8 }
 0x360   : > { %p734_p1 = pnand %p737_p0, %p978_p8 }
 0x362   : > { %p735_p2 = pneg %p734_p1 }
 0x364   : > { %858 = dma.done.wait (%p735_p2), %s609_s10, 768  }
 0x365   : > { %860 = vsyncadd (%p735_p2), %s609_s10, 4294966528  ;;  %s20_s29 = sadd.s32 1, %s883_s29   ;;  %s1102_s24 = smov %s867_s25 }
 0x366   : > { %p17_p3 = scmp.ge.s32.totalorder %s20_s29, 4   ;;  %s1103_s25 = smov %s871_s26 }
 0x367   : > { %s1104_s26 = smov %s984_s14  ;;  %s1105_s27 = smov %s879_s28 }
 0x368   : > { %s1106_s28 = smov %s1108_s9  ;;  %19 = sbr.rel (!%p17_p3) target bundleno = 4 (0x4), region = 89 }
 0x36d   :  { %614 = vsyncpa [#allocation3], 1 }
 0x36e   :  { %616 = vsyncpa [#allocation3 + $0x1], 1 }

// kernel: make_a_scene_forward.3
= control target key start
LH: loop header
LB: loop body
LE: loop exit
PB: predicated region body
PF: predicated region fallthrough
CT: control target
= control target key end

     0   :  { %s2953_s24 = smov 0   ;;  %s3430_s0 = inlined_call_operand.vmem [shape: f32[2,32,32], index: 0, kind: input, shape index: {}, may-alias: {0,17}]   ;;  %s3431_s1 = inlined_call_operand.vmem [shape: f32[1,32], index: 1, kind: input, shape index: {}]   ;;  %s3432_s2 = inlined_call_operand.vmem [shape: f32[1,32], index: 2, kind: input, shape index: {}]   ;;  %s3433_s3 = inlined_call_operand.vmem [shape: bf16[32,96], index: 3, kind: input, shape index: {}]   ;;  %s3434_s4 = inlined_call_operand.vmem [shape: f32[1,96], index: 4, kind: input, shape index: {}]   ;;  %s3435_s5 = inlined_call_operand.vmem [shape: bf16[4,8,32], index: 5, kind: input, shape index: {}]   ;;  %s3436_s6 = inlined_call_operand.vmem [shape: f32[1,32], index: 6, kind: input, shape index: {}]   ;;  %s3437_s7 = inlined_call_operand.vmem [shape: f32[1,32], index: 7, kind: input, shape index: {}]   ;;  %s3438_s8 = inlined_call_operand.vmem [shape: f32[1,32], index: 8, kind: input, shape index: {}]   ;;  %s3439_s9 = inlined_call_operand.vmem [shape: f32[1,32], index: 9, kind: input, shape index: {}]   ;;  %s3440_s10 = inlined_call_operand.vmem [shape: f32[1,32], index: 10, kind: input, shape index: {}]   ;;  %s3441_s11 = inlined_call_operand.vmem [shape: bf16[32,128], index: 11, kind: input, shape index: {}]   ;;  %s3442_s12 = inlined_call_operand.vmem [shape: f32[1,128], index: 12, kind: input, shape index: {}]   ;;  %s3443_s13 = inlined_call_operand.vmem [shape: bf16[128,32], index: 13, kind: input, shape index: {}]   ;;  %s3444_s14 = inlined_call_operand.vmem [shape: f32[1,32], index: 14, kind: input, shape index: {}]   ;;  %s3445_s15 = inlined_call_operand.vmem [shape: f32[1,32], index: 15, kind: input, shape index: {}]   ;;  %s3446_s16 = inlined_call_operand.vmem [shape: f32[1,32], index: 16, kind: input, shape index: {}]   ;;  %s3447_s17 = inlined_call_operand.vmem [shape: f32[2,32,32], index: 17, kind: output, shape index: {}, may-alias: {0,17}]  }
   0x1   :  { %3448 = sst [smem:[#allocation2_spill]] %s3430_s0 }
   0x2   :  { %3449 = sst [smem:[#allocation3_spill]] %s3431_s1 }
   0x3 LB: > { %s2437_s25 = sadd.s32 4294967295, %s2856_s24   ;;  %p2441_p0 = scmp.ge.s32.totalorder %s2856_s24, 1  ;;  %s2856_s24 = sphi %s2953_s24, %s27_s24  }
   0x4   : > { %p487_p1 = scmp.lt.s32.totalorder %s2856_s24, 3 }
   0x6   : > { %p488_p2 = pnand %p2441_p0, %p487_p1 }
   0x7   : > { %p539_p3 = scmp.lt.s32.totalorder (!%p488_p2), %s2437_s25, 1  ;;  %s3450_s29 = sld [smem:[#allocation2_spill]] (!%p488_p2) }
   0x8   : > { %491 = sbr.rel (%p488_p2) target bundleno = 3044 (0xbe4), region = 88  ;;  %s3451_s22 = sld [smem:[#allocation3_spill]] (!%p488_p2) }
   0x9   : > { %s2858_s30 = smov (!%p488_p2), 120   ;;  %s2859_s18 = smov (!%p488_p2), 112  }
   0xa   : > { %s2860_s19 = smov (!%p488_p2), 104   ;;  %s2861_s1 = smov (!%p488_p2), 96  }
   0xb   : > { %s2862_s20 = smov (!%p488_p2), 64  }
   0xd   : > { %s3453_s25 = smov (!%p539_p3, %s2437_s25), 1  ;;  %vm556_vm0 = vcmask 261120   ;;  %v2698_v28 = vld [vmem:[%s3433_s3 + $0x8] sm:$0xff]   ;;  %v2699_v29 = vld [vmem:[%s3433_s3] sm:$0xff]   ;;  %vm834_vm1 = vcmask 64512   ;;  %vm841_vm2 = vcmask 1043456  }
   0xe   : > { %s2500_s26 = sshll.u32 %s3453_s25, 5  ;;  %2560 = vmatprep.subr.bf16.mxu0 %v2698_v28  ;;  %v2446_v44 = vld [vmem:[%s3451_s22] ss:$0 sm:$0xff] }
   0xf   : > { %s2969_s0 = scalar_lea.vmem %s3450_s29, %s2500_s26  ;;  %2561 = vmatpush3.bf16.msra.mxu0 %v2698_v28  ;;  %v2447_v49 = vld [vmem:[%s3432_s2] ss:$0 sm:$0xff]  ;;  %s548_s22 = scalar_lea.vmem %s3447_s17, %s2500_s26 }
  0x10   : > { %v550_v0 = vld [vmem:[%s2969_s0] sm:$0xff]  ;;  %v552_v1 = vld [vmem:[%s2969_s0 + $0x10] sm:$0xff]  ;;  %v551_v2 = vld [vmem:[%s2969_s0 + $0x8] sm:$0xff]  ;;  %2562 = vmatprep.subr.bf16.mxu0 %v2699_v29 }
  0x11   : > { %v557_v3 = vsel %vm556_vm0, %v550_v0, 0.0  ;;  %v563_v4 = vsel %vm556_vm0, %v552_v1, 0.0  ;;  %v553_v5 = vld [vmem:[%s2969_s0 + $0x18] sm:$0xff]  ;;  %v560_v6 = vsel %vm556_vm0, %v551_v2, 0.0  ;;  %v2448_v63 = vld [vmem:[%s3434_s4] ss:$0 sm:$0xff] }
  0x12   : > { %558 = vadd.xlane.f32.xlu0 %v557_v3  ;;  %564 = vadd.xlane.f32.xlu1 %v563_v4  ;;  %v566_v7 = vsel %vm556_vm0, %v553_v5, 0.0 }
  0x13   : > { %2563 = vmatpush3.bf16.msra.mxu0 %v2699_v29 }
  0x16   : > { %561 = vadd.xlane.f32.xlu0 %v560_v6  ;;  %567 = vadd.xlane.f32.xlu1 %v566_v7 }
  0x9b   : > { %v559_v8 = vpop.xlane.xlu0 %558  ;;  %v565_v9 = vpop.xlane.xlu1 %564 }
  0x9c   : > { %v570_v10 = vmul.f32 0.03125, %v559_v8  ;;  %v572_v11 = vmul.f32 0.03125, %v565_v9 }
  0x9e   : > { %v574_v12 = vsub.f32 %v550_v0, %v570_v10  ;;  %v576_v13 = vsub.f32 %v552_v1, %v572_v11 }
  0x9f   : > { %v562_v14 = vpop.xlane.xlu0 %561  ;;  %v568_v15 = vpop.xlane.xlu1 %567 }
  0xa0   : > { %v571_v16 = vmul.f32 0.03125, %v562_v14  ;;  %v573_v17 = vmul.f32 0.03125, %v568_v15  ;;  %v578_v18 = vmul.f32 %v574_v12, %v574_v12  ;;  %v580_v19 = vmul.f32 %v576_v13, %v576_v13 }
  0xa2   : > { %v575_v20 = vsub.f32 %v551_v2, %v571_v16  ;;  %v577_v21 = vsub.f32 %v553_v5, %v573_v17  ;;  %v582_v22 = vsel %vm556_vm0, %v578_v18, 0.0  ;;  %v588_v23 = vsel %vm556_vm0, %v580_v19, 0.0 }
  0xa3   : > { %583 = vadd.xlane.f32.xlu0 %v582_v22 }
  0xa4   : > { %v579_v24 = vmul.f32 %v575_v20, %v575_v20  ;;  %v581_v25 = vmul.f32 %v577_v21, %v577_v21 }
  0xa6   : > { %v585_v26 = vsel %vm556_vm0, %v579_v24, 0.0  ;;  %v591_v27 = vsel %vm556_vm0, %v581_v25, 0.0 }
  0xa7   : > { %589 = vadd.xlane.f32.xlu0 %v588_v23  ;;  %586 = vadd.xlane.f32.xlu1 %v585_v26 }
  0xab   : > { %592 = vadd.xlane.f32.xlu1 %v591_v27 }
 0x12c   : > { %v584_v30 = vpop.xlane.xlu0 %583 }
 0x12d   : > { %v594_v31 = vmul.f32 0.03125, %v584_v30 }
 0x12f   : > { %v598_v32 = vadd.f32 1e-05, %v594_v31 }
 0x130   : > { %v587_v33 = vpop.xlane.xlu1 %586  ;;  %v590_v34 = vpop.xlane.xlu0 %589 }
 0x131   : > { %2710 = vrsqrt.f32 %v598_v32  ;;  %v595_v35 = vmul.f32 0.03125, %v587_v33  ;;  %v596_v36 = vmul.f32 0.03125, %v590_v34 }
 0x133   : > { %v599_v37 = vadd.f32 1e-05, %v595_v35  ;;  %v600_v38 = vadd.f32 1e-05, %v596_v36 }
 0x134   : > { %v593_v39 = vpop.xlane.xlu1 %592 }
 0x135   : > { %2712 = vrsqrt.f32 %v599_v37  ;;  %v597_v40 = vmul.f32 0.03125, %v593_v39 }
 0x136   : > { %2714 = vrsqrt.f32 %v600_v38 }
 0x137   : > { %v601_v41 = vadd.f32 1e-05, %v597_v40 }
 0x139   : > { %2716 = vrsqrt.f32 %v601_v41 }
 0x13e   : > { %v2711_v42 = vpop.eup %2710 }
 0x13f   : > { %v606_v43 = vmul.f32 %v2711_v42, %v574_v12 }
 0x141   : > { %v616_v48 = vmul.f32 %v2446_v44, %v606_v43 }
 0x142   : > { %v2713_v45 = vpop.eup %2712 }
 0x143   : > { %v2715_v46 = vpop.eup %2714  ;;  %v607_v47 = vmul.f32 %v2713_v45, %v575_v20  ;;  %v626_v53 = vadd.f32 %v2447_v49, %v616_v48 }
 0x144   : > { %v608_v50 = vmul.f32 %v2715_v46, %v576_v13 }
 0x145   : > { %v617_v51 = vmul.f32 %v2446_v44, %v607_v47 }
 0x146   : > { %v2717_v52 = vpop.eup %2716  ;;  %v618_v56 = vmul.f32 %v2446_v44, %v608_v50 }
 0x147   : > { %v627_v54 = vadd.f32 %v2447_v49, %v617_v51  ;;  %v609_v55 = vmul.f32 %v2717_v52, %v577_v21 }
 0x148   : > { %v628_v59 = vadd.f32 %v2447_v49, %v618_v56 }
 0x149   : > { %v630_v57 = vpack.c.bf16 %v627_v54, %v626_v53  ;;  %v619_v58 = vmul.f32 %v2446_v44, %v609_v55 }
 0x14b   : > { %2564 = vmatprep.mubr.msk.bf16.mxu0 %vm556_vm0, %v630_v57  ;;  %v629_v60 = vadd.f32 %v2447_v49, %v619_v58  ;;  %v1068_v49 = vlaneseq }
 0x14d   : > { %v631_v61 = vpack.c.bf16 %v629_v60, %v628_v59  ;;  %v1069_v50 = vshrl.u32 %v1068_v49, 7  ;;  %v3047_v52 = vand.u32 127, %v1068_v49 }
 0x14f   : > { %2565 = vmatmul.mubr.msk.bf16.vlgmr.msra.gmra.mxu0 %vm556_vm0, %v631_v61  ;;  %v1071_v51 = vadd.s32 16, %v1069_v50  ;;  %vm1075_vm4 = vcmp.ge.s32.totalorder %v1069_v50, %v3047_v52  ;;  %v1072_v54 = vadd.s32 24, %v1069_v50  ;;  %v1070_v55 = vadd.s32 8, %v1069_v50 }
 0x151   : > { %vm1077_vm3 = vcmp.ge.s32.totalorder %v1071_v51, %v3047_v52  ;;  %vm1078_vm5 = vcmp.ge.s32.totalorder %v1072_v54, %v3047_v52  ;;  %vm1076_vm6 = vcmp.ge.s32.totalorder %v1070_v55, %v3047_v52 }
 0x20f   : > { %v2566_v62 = vpop.f32.mrf.mxu0 }
 0x210   : > { %v704_v1 = vadd.f32 %v2566_v62, %v2448_v63 }
 0x211   : > { %v695_v0 = vpop.f32.mrf.mxu0 }
 0x212   : > { %v696_v3 = vadd.f32 %v2448_v63, %v695_v0  ;;  %v712_v6 = vmul.f32 0.35355338, %v704_v1 }
 0x213   : > { %v2567_v2 = vpop.f32.mrf.mxu0 }
 0x214   : > { %v707_v4 = vadd.f32 %v2567_v2, %v2448_v63  ;;  %v710_v10 = vmul.f32 0.35355338, %v696_v3 }
 0x215   : > { %v698_v5 = vpop.f32.mrf.mxu0 }
 0x216   : > { %v713_v7 = vmul.f32 0.35355338, %v707_v4  ;;  %v3000_v8 = vpack.c.bf16 %v707_v4, %v704_v1  ;;  %v699_v9 = vadd.f32 %v2448_v63, %v698_v5 }
 0x218   : > { %v3002_v11 = vpack.c.bf16 %v713_v7, %v712_v6  ;;  %v711_v12 = vmul.f32 0.35355338, %v699_v9  ;;  %v730_v13 = vpack.c.bf16 %v699_v9, %v696_v3  ;;  %736 = vrot.lane.b32.xlu1 %v3000_v8, %s2858_s30 }
 0x21a   : > { %v714_v14 = vpack.c.bf16 %v711_v12, %v710_v10  ;;  %734 = vrot.lane.b32.xlu0 %v730_v13, %s2858_s30 }
 0x21c   : > { %740 = vrot.lane.b32.xlu1 %v3000_v8, %s2859_s18  ;;  %2570 = vmatprep.mubr.msk.bf16.mxu0 %vm834_vm1, %v714_v14 }
 0x21e   : > { %742 = vrot.lane.b32.xlu0 %v730_v13, %s2860_s19 }
 0x220   : > { %738 = vrot.lane.b32.xlu1 %v730_v13, %s2859_s18 }
 0x222   : > { %746 = vrot.lane.b32.xlu0 %v730_v13, %s2861_s1 }
 0x224   : > { %744 = vrot.lane.b32.xlu1 %v3000_v8, %s2860_s19 }
 0x228   : > { %748 = vrot.lane.b32.xlu1 %v3000_v8, %s2861_s1 }
 0x28a   : > { %v737_v15 = vpop.permute.xlu1 %736 }
 0x28b   : > { %752 = vrot.lane.b32.xlu1 %v737_v15, %s2861_s1 }
 0x28c   : > { %v735_v16 = vpop.permute.xlu0 %734 }
 0x28d   : > { %750 = vrot.lane.b32.xlu0 %v735_v16, %s2861_s1 }
 0x28e   : > { %v741_v17 = vpop.permute.xlu1 %740 }
 0x28f   : > { %756 = vrot.lane.b32.xlu1 %v741_v17, %s2861_s1 }
 0x290   : > { %v3012_v20 = vpop.permute.xlu0 %742 }
 0x291   : > { %718 = vrot.lane.b32.xlu0 %v714_v14, %s2858_s30 }
 0x292   : > { %v3009_v18 = vpop.permute.xlu1 %738 }
 0x294   : > { %v747_v21 = vpop.permute.xlu0 %746 }
 0x295   : > { %754 = vrot.lane.b32.xlu0 %v3009_v18, %s2861_s1 }
 0x296   : > { %v745_v19 = vpop.permute.xlu1 %744 }
 0x297   : > { %760 = vrot.lane.b32.xlu1 %v745_v19, %s2861_s1 }
 0x299   : > { %758 = vrot.lane.b32.xlu0 %v3012_v20, %s2861_s1 }
 0x29a   : > { %v749_v22 = vpop.permute.xlu1 %748 }
 0x29b   : > { %720 = vrot.lane.b32.xlu1 %v3002_v11, %s2858_s30 }
 0x29d   : > { %722 = vrot.lane.b32.xlu0 %v714_v14, %s2859_s18 }
 0x29f   : > { %724 = vrot.lane.b32.xlu1 %v3002_v11, %s2859_s18 }
 0x2a1   : > { %726 = vrot.lane.b32.xlu0 %v714_v14, %s2860_s19 }
 0x2a3   : > { %728 = vrot.lane.b32.xlu1 %v3002_v11, %s2860_s19 }
 0x2bf   : > { %770 = vxpose.xlu0.c.b16.start [1/2] (short) (narrow) %v747_v21, 16 }
 0x2c3   : > { %771 = vxpose.xlu0.c.b16.end [2/2] (short) (narrow) %v749_v22, 16 }
 0x2fd   : > { %v753_v24 = vpop.permute.xlu1 %752 }
 0x2ff   : > { %v751_v23 = vpop.permute.xlu0 %750 }
 0x300   : > { %786 = vxpose.xlu1.c.b16.start [1/2] (short) (narrow) %v751_v23, 16 }
 0x301   : > { %v757_v27 = vpop.permute.xlu1 %756 }
 0x303   : > { %v719_v25 = vpop.permute.xlu0 %718 }
 0x304   : > { %787 = vxpose.xlu1.c.b16.end [2/2] (short) (narrow) %v753_v24, 16 }
 0x307   : > { %v755_v26 = vpop.permute.xlu0 %754 }
 0x308   : > { %1398 = vrot.lane.b32.xlu1 %v737_v15, %s2862_s20  ;;  %802 = vxpose.xlu0.c.b16.start [1/2] (short) (narrow) %v755_v26, 16 }
 0x309   : > { %v761_v30 = vpop.permute.xlu1 %760 }
 0x30b   : > { %v759_v28 = vpop.permute.xlu0 %758 }
 0x30c   : > { %1335 = vrot.lane.b32.xlu1 %v730_v13, %s2862_s20  ;;  %803 = vxpose.xlu0.c.b16.end [2/2] (short) (narrow) %v757_v27, 16 }
 0x30d   : > { %v721_v34 = vpop.permute.xlu1 %720 }
 0x30f   : > { %v723_v29 = vpop.permute.xlu0 %722 }
 0x310   : > { %1396 = vrot.lane.b32.xlu1 %v735_v16, %s2862_s20  ;;  %818 = vxpose.xlu0.c.b16.start [1/2] (short) (narrow) %v759_v28, 16 }
 0x311   : > { %v725_v35 = vpop.permute.xlu1 %724 }
 0x313   : > { %v727_v31 = vpop.permute.xlu0 %726 }
 0x314   : > { %1520 = vrot.lane.b32.xlu1 %v745_v19, %s2862_s20  ;;  %819 = vxpose.xlu0.c.b16.end [2/2] (short) (narrow) %v761_v30, 16 }
 0x315   : > { %2588 = vmatprep.mubr.msk.bf16.mxu1 %vm834_vm1, %v727_v31  ;;  %v729_v36 = vpop.permute.xlu1 %728 }
 0x31d   : > { %1337 = vrot.lane.b32.xlu0 %v3000_v8, %s2862_s20 }
 0x321   : > { %1459 = vrot.lane.b32.xlu0 %v741_v17, %s2862_s20  ;;  %v778_v32 = vpop.trf.xlu0 }
 0x322   : > { %v843_v33 = vsel %vm841_vm2, %v778_v32, 0  ;;  %2676 = vmatprep.subr.msk.bf16.mxu0 %vm841_vm2, %v778_v32 }
 0x323   : > { %2569 = vmatpush3.bf16.msra.mxu0 %v843_v33 }
 0x326   : > { %2571 = vmatmul.mubr.msk.bf16.vlgmr.msra.gmra.mxu0 %vm834_vm1, %v3002_v11 }
 0x327   : > { %2576 = vmatprep.mubr.msk.bf16.mxu0 %vm834_vm1, %v719_v25 }
 0x362   : > { %v794_v37 = vpop.trf.xlu1 }
 0x363   : > { %v901_v38 = vsel %vm841_vm2, %v794_v37, 0  ;;  %2677 = vmatprep.subr.msk.bf16.mxu0 %vm841_vm2, %v794_v37 }
 0x364   : > { %2575 = vmatpush3.bf16.msra.mxu0 %v901_v38 }
 0x367   : > { %2577 = vmatmul.mubr.msk.bf16.vlgmr.msra.gmra.mxu0 %vm834_vm1, %v721_v34 }
 0x368   : > { %2582 = vmatprep.mubr.msk.bf16.mxu0 %vm834_vm1, %v723_v29 }
 0x36a   : > { %v810_v39 = vpop.trf.xlu0 }
 0x36b   : > { %v959_v40 = vsel %vm841_vm2, %v810_v39, 0  ;;  %2678 = vmatprep.subr.msk.bf16.mxu0 %vm841_vm2, %v810_v39 }
 0x36c   : > { %2581 = vmatpush3.bf16.msra.mxu0 %v959_v40 }
 0x36f   : > { %2583 = vmatmul.mubr.msk.bf16.vlgmr.msra.gmra.mxu0 %vm834_vm1, %v725_v35 }
 0x372   : > { %v826_v41 = vpop.trf.xlu0 }
 0x373   : > { %2679 = vmatprep.subr.msk.bf16.mxu1 %vm841_vm2, %v826_v41  ;;  %v1017_v42 = vsel %vm841_vm2, %v826_v41, 0 }
 0x374   : > { %2587 = vmatpush3.bf16.msra.mxu1 %v1017_v42 }
 0x377   : > { %2589 = vmatmul.mubr.msk.bf16.vlgmr.msra.gmra.mxu1 %vm834_vm1, %v729_v36 }
 0x37a   : > { %v1399_v43 = vpop.permute.xlu1 %1398 }
 0x37b   : > { %2600 = vmatprep.subr.bf16.mxu1 %v1399_v43 }
 0x37c   : > { %2601 = vmatpush3.bf16.msra.mxu1 %v1399_v43 }
 0x37e   : > { %v1336_v44 = vpop.permute.xlu1 %1335 }
 0x382   : > { %v1397_v45 = vpop.permute.xlu1 %1396 }
 0x383   : > { %2602 = vmatprep.subr.bf16.mxu1 %v1397_v45 }
 0x384   : > { %2603 = vmatpush3.bf16.msra.mxu1 %v1397_v45 }
 0x386   : > { %v3041_v46 = vpop.permute.xlu1 %1520 }
 0x387   : > { %2616 = vmatprep.subr.bf16.mxu1 %v3041_v46 }
 0x38f   : > { %v1338_v47 = vpop.permute.xlu0 %1337 }
 0x390   : > { %2592 = vmatprep.subr.bf16.mxu0 %v1338_v47 }
 0x391   : > { %2593 = vmatpush3.bf16.msra.mxu0 %v1338_v47 }
 0x392   : > { %2594 = vmatprep.subr.bf16.mxu0 %v1336_v44 }
 0x393   : > { %v3044_v48 = vpop.permute.xlu0 %1459 }
 0x395   : > { %2595 = vmatpush3.bf16.msra.mxu0 %v1336_v44 }
 0x396   : > { %2608 = vmatprep.subr.bf16.mxu0 %v3044_v48 }
 0x3e6   : > { %v2572_v53 = vpop.f32.mrf.mxu0 }
 0x3e7   : > { %v3053_v56 = vsel %vm1077_vm3, %v2572_v53, -10000.0 }
 0x3e8   : > { %v879_v57 = vpop.f32.mrf.mxu0  ;;  %v1109_v58 = vsel %vm556_vm0, %v3053_v56, -inf }
 0x3e9   : > { %v3059_v59 = vsel %vm1075_vm4, %v879_v57, -10000.0  ;;  %1110 = vmax.xlane.f32.xlu1 %v1109_v58 }
 0x3ea   : > { %v2573_v60 = vpop.f32.mrf.mxu0  ;;  %v1103_v62 = vsel %vm556_vm0, %v3059_v59, -inf }
 0x3eb   : > { %v3067_v63 = vsel %vm1078_vm5, %v2573_v60, -10000.0 }
 0x3ec   : > { %v882_v61 = vpop.f32.mrf.mxu0  ;;  %v1112_v2 = vsel %vm556_vm0, %v3067_v63, -inf }
 0x3ed   : > { %v3071_v0 = vsel %vm1076_vm6, %v882_v61, -10000.0  ;;  %1104 = vmax.xlane.f32.xlu1 %v1103_v62 }
 0x3ee   : > { %v1106_v1 = vsel %vm556_vm0, %v3071_v0, -inf }
 0x3ef   : > { %1107 = vmax.xlane.f32.xlu0 %v1106_v1 }
 0x3f1   : > { %1113 = vmax.xlane.f32.xlu1 %v1112_v2 }
 0x427   : > { %v2578_v3 = vpop.f32.mrf.mxu0 }
 0x428   : > { %v3079_v4 = vsel %vm1077_vm3, %v2578_v3, -10000.0 }
 0x429   : > { %v937_v5 = vpop.f32.mrf.mxu0  ;;  %v1121_v6 = vsel %vm556_vm0, %v3079_v4, -inf }
 0x42a   : > { %1122 = vmax.xlane.f32.xlu0 %v1121_v6  ;;  %v3097_v15 = vsel %vm1075_vm4, %v937_v5, -10000.0 }
 0x42b   : > { %v2579_v7 = vpop.f32.mrf.mxu0  ;;  %v1115_v21 = vsel %vm556_vm0, %v3097_v15, -inf }
 0x42c   : > { %v3085_v8 = vsel %vm1078_vm5, %v2579_v7, -10000.0 }
 0x42d   : > { %v1124_v9 = vsel %vm556_vm0, %v3085_v8, -inf  ;;  %v940_v10 = vpop.f32.mrf.mxu0 }
 0x42e   : > { %1125 = vmax.xlane.f32.xlu1 %v1124_v9  ;;  %v3109_v23 = vsel %vm1076_vm6, %v940_v10, -10000.0 }
 0x42f   : > { %v2584_v16 = vpop.f32.mrf.mxu0  ;;  %v1118_v28 = vsel %vm556_vm0, %v3109_v23, -inf }
 0x430   : > { %v3121_v29 = vsel %vm1077_vm3, %v2584_v16, -10000.0 }
 0x431   : > { %v995_v25 = vpop.f32.mrf.mxu0  ;;  %v1133_v33 = vsel %vm556_vm0, %v3121_v29, -inf }
 0x432   : > { %v3133_v34 = vsel %vm1075_vm4, %v995_v25, -10000.0 }
 0x433   : > { %v2585_v31 = vpop.f32.mrf.mxu0  ;;  %v1127_v37 = vsel %vm556_vm0, %v3133_v34, -inf }
 0x434   : > { %v3137_v35 = vsel %vm1078_vm5, %v2585_v31, -10000.0 }
 0x435   : > { %v998_v36 = vpop.f32.mrf.mxu0  ;;  %v1136_v38 = vsel %vm556_vm0, %v3137_v35, -inf }
 0x436   : > { %v3145_v39 = vsel %vm1076_vm6, %v998_v36, -10000.0 }
 0x437   : > { %v2590_v11 = vpop.f32.mrf.mxu1  ;;  %v1130_v40 = vsel %vm556_vm0, %v3145_v39, -inf }
 0x438   : > { %v3091_v12 = vsel %vm1077_vm3, %v2590_v11, -10000.0 }
 0x439   : > { %v1053_v13 = vpop.f32.mrf.mxu1  ;;  %v1145_v14 = vsel %vm556_vm0, %v3091_v12, -inf }
 0x43a   : > { %1146 = vmax.xlane.f32.xlu0 %v1145_v14  ;;  %v3113_v24 = vsel %vm1075_vm4, %v1053_v13, -10000.0 }
 0x43b   : > { %v2591_v17 = vpop.f32.mrf.mxu1  ;;  %v1139_v27 = vsel %vm556_vm0, %v3113_v24, -inf }
 0x43c   : > { %v3101_v19 = vsel %vm1078_vm5, %v2591_v17, -10000.0 }
 0x43d   : > { %v1148_v22 = vsel %vm556_vm0, %v3101_v19, -inf  ;;  %v1056_v26 = vpop.f32.mrf.mxu1 }
 0x43e   : > { %1116 = vmax.xlane.f32.xlu0 %v1115_v21  ;;  %1149 = vmax.xlane.f32.xlu1 %v1148_v22  ;;  %v3125_v30 = vsel %vm1076_vm6, %v1056_v26, -10000.0 }
 0x43f   : > { %v1142_v32 = vsel %vm556_vm0, %v3125_v30, -inf }
 0x442   : > { %1140 = vmax.xlane.f32.xlu0 %v1139_v27  ;;  %1119 = vmax.xlane.f32.xlu1 %v1118_v28 }
 0x446   : > { %1143 = vmax.xlane.f32.xlu1 %v1142_v32  ;;  %1134 = vmax.xlane.f32.xlu0 %v1133_v33 }
 0x44a   : > { %1128 = vmax.xlane.f32.xlu0 %v1127_v37  ;;  %1137 = vmax.xlane.f32.xlu1 %v1136_v38 }
 0x44e   : > { %1131 = vmax.xlane.f32.xlu1 %v1130_v40 }
 0x45f   : > { %1518 = vrot.lane.b32.xlu1 %v3012_v20, %s2862_s20 }
 0x460   : > { %1457 = vrot.lane.b32.xlu0 %v3009_v18, %s2862_s20 }
 0x472   : > { %v3153_v41 = vpop.xlane.xlu1 %1110 }
 0x473   : > { %v1201_v42 = vsub.f32 %v3053_v56, %v3153_v41 }
 0x475   : > { %v1219_v43 = vmul.f32 1.442695, %v1201_v42 }
 0x476   : > { %v3157_v44 = vpop.xlane.xlu1 %1104 }
 0x477   : > { %v1199_v45 = vsub.f32 %v3059_v59, %v3157_v44  ;;  %2718 = vpow2.f32 %v1219_v43 }
 0x478   : > { %v3161_v47 = vpop.xlane.xlu0 %1107 }
 0x479   : > { %v1215_v49 = vmul.f32 1.442695, %v1199_v45  ;;  %v1200_v20 = vsub.f32 %v3071_v0, %v3161_v47 }
 0x47a   : > { %v3165_v50 = vpop.xlane.xlu1 %1113 }
 0x47b   : > { %v1217_v18 = vmul.f32 1.442695, %v1200_v20  ;;  %2720 = vpow2.f32 %v1215_v49  ;;  %v1202_v51 = vsub.f32 %v3067_v63, %v3165_v50  ;;  %v1635_v49 = vld [vmem:[%s3435_s5] sm:$0xf] }
 0x47d   : > { %2722 = vpow2.f32 %v1217_v18  ;;  %v1221_v52 = vmul.f32 1.442695, %v1202_v51 }
 0x47f   : > { %2724 = vpow2.f32 %v1221_v52 }
 0x484   : > { %v2719_v53 = vpop.eup %2718 }
 0x485   : > { %v1269_v54 = vsel %vm556_vm0, %v2719_v53, 0.0 }
 0x486   : > { %1270 = vadd.xlane.f32.xlu0 %v1269_v54 }
 0x488   : > { %v2721_v55 = vpop.eup %2720 }
 0x489   : > { %v1263_v56 = vsel %vm556_vm0, %v2721_v55, 0.0 }
 0x48a   : > { %v2723_v57 = vpop.eup %2722  ;;  %1264 = vadd.xlane.f32.xlu0 %v1263_v56 }
 0x48b   : > { %v1266_v58 = vsel %vm556_vm0, %v2723_v57, 0.0  ;;  %v1327_v59 = vpack.c.bf16 %v2723_v57, %v2721_v55 }
 0x48c   : > { %v2725_v60 = vpop.eup %2724  ;;  %1267 = vadd.xlane.f32.xlu1 %v1266_v58 }
 0x48d   : > { %2596 = vmatprep.mubr.msk.bf16.mxu0 %vm556_vm0, %v1327_v59  ;;  %v1272_v61 = vsel %vm556_vm0, %v2725_v60, 0.0  ;;  %v1328_v62 = vpack.c.bf16 %v2725_v60, %v2719_v53 }
 0x48e   : > { %1273 = vadd.xlane.f32.xlu0 %v1272_v61 }
 0x48f   : > { %2597 = vmatmul.mubr.msk.bf16.vlgmr.msra.gmra.mxu0 %vm556_vm0, %v1328_v62 }
 0x490   : > { %2609 = vmatpush3.bf16.msra.mxu0 %v3044_v48 }
 0x4b3   : > { %v3176_v63 = vpop.xlane.xlu0 %1122 }
 0x4b4   : > { %v1205_v0 = vsub.f32 %v3079_v4, %v3176_v63 }
 0x4b6   : > { %v1227_v1 = vmul.f32 1.442695, %v1205_v0 }
 0x4b7   : > { %v3180_v2 = vpop.xlane.xlu1 %1125 }
 0x4b8   : > { %v1206_v3 = vsub.f32 %v3085_v8, %v3180_v2  ;;  %2726 = vpow2.f32 %v1227_v1 }
 0x4ba   : > { %v1229_v5 = vmul.f32 1.442695, %v1206_v3 }
 0x4bc   : > { %2728 = vpow2.f32 %v1229_v5 }
 0x4c3   : > { %v3184_v6 = vpop.xlane.xlu0 %1146 }
 0x4c4   : > { %v1213_v36 = vsub.f32 %v3091_v12, %v3184_v6 }
 0x4c5   : > { %v3186_v7 = vpop.eup %2726 }
 0x4c6   : > { %v1281_v4 = vsel %vm556_vm0, %v3186_v7, 0.0  ;;  %v1243_v43 = vmul.f32 1.442695, %v1213_v36 }
 0x4c7   : > { %v3188_v9 = vpop.xlane.xlu0 %1116  ;;  %v3190_v48 = vpop.xlane.xlu1 %1149  ;;  %1282 = vadd.xlane.f32.xlu0 %v1281_v4 }
 0x4c8   : > { %v1203_v10 = vsub.f32 %v3097_v15, %v3188_v9 }
 0x4c9   : > { %v2729_v11 = vpop.eup %2728 }
 0x4ca   : > { %v1223_v8 = vmul.f32 1.442695, %v1203_v10  ;;  %v1284_v16 = vsel %vm556_vm0, %v2729_v11, 0.0  ;;  %v1330_v54 = vpack.c.bf16 %v2729_v11, %v3186_v7  ;;  %v1646_v11 = vsel %vm841_vm2, %v1635_v49, 0 }
 0x4cb   : > { %v3196_v13 = vpop.xlane.xlu0 %1140  ;;  %v3198_v14 = vpop.xlane.xlu1 %1119  ;;  %1285 = vadd.xlane.f32.xlu1 %v1284_v16 }
 0x4cc   : > { %v1211_v17 = vsub.f32 %v3113_v24, %v3196_v13  ;;  %2730 = vpow2.f32 %v1223_v8  ;;  %v1204_v21 = vsub.f32 %v3109_v23, %v3198_v14  ;;  %v1214_v24 = vsub.f32 %v3101_v19, %v3190_v48 }
 0x4ce   : > { %v1239_v22 = vmul.f32 1.442695, %v1211_v17  ;;  %v1225_v25 = vmul.f32 1.442695, %v1204_v21  ;;  %v1245_v37 = vmul.f32 1.442695, %v1214_v24 }
 0x4cf   : > { %v3205_v15 = vpop.xlane.xlu1 %1143  ;;  %v3207_v26 = vpop.xlane.xlu0 %1134  ;;  %v1153_v17 = vsub.f32 -inf, %v3153_v41  ;;  %v1154_v21 = vsub.f32 -inf, %v3165_v50 }
 0x4d0   : > { %v1212_v27 = vsub.f32 %v3125_v30, %v3205_v15  ;;  %2732 = vpow2.f32 %v1239_v22  ;;  %v1209_v28 = vsub.f32 %v3121_v29, %v3207_v26  ;;  %v1151_v22 = vsub.f32 -inf, %v3157_v44  ;;  %v3264_v44 = vld [vmem:[%s3435_s5 + $0xc] sm:$0xf] }
 0x4d1   : > { %2734 = vpow2.f32 %v1225_v25  ;;  %v1152_v25 = vsub.f32 -inf, %v3161_v47  ;;  %v1173_v24 = vmul.f32 1.442695, %v1154_v21  ;;  %v1637_v47 = vld [vmem:[%s3435_s5 + $0x8] sm:$0xf] }
 0x4d2   : > { %v1241_v31 = vmul.f32 1.442695, %v1212_v27  ;;  %v1235_v32 = vmul.f32 1.442695, %v1209_v28  ;;  %v1171_v27 = vmul.f32 1.442695, %v1153_v17 }
 0x4d3   : > { %v3215_v23 = vpop.xlane.xlu0 %1128  ;;  %v3217_v33 = vpop.xlane.xlu1 %1137  ;;  %v1636_v28 = vld [vmem:[%s3435_s5 + $0x4] sm:$0xf]  ;;  %v1169_v36 = vmul.f32 1.442695, %v1152_v25 }
 0x4d4   : > { %v1207_v30 = vsub.f32 %v3133_v34, %v3215_v23  ;;  %2736 = vpow2.f32 %v1241_v31  ;;  %v1210_v29 = vsub.f32 %v3137_v35, %v3217_v33  ;;  %v1704_v31 = vsel %vm841_vm2, %v1636_v28, 0 }
 0x4d5   : > { %2738 = vpow2.f32 %v1235_v32  ;;  %v1167_v32 = vmul.f32 1.442695, %v1151_v22 }
 0x4d6   : > { %v1231_v38 = vmul.f32 1.442695, %v1207_v30  ;;  %v1237_v19 = vmul.f32 1.442695, %v1210_v29 }
 0x4d7   : > { %v1458_v40 = vpop.permute.xlu0 %1457  ;;  %v3225_v42 = vpop.xlane.xlu1 %1131 }
 0x4d8   : > { %v1208_v45 = vsub.f32 %v3145_v39, %v3225_v42  ;;  %2610 = vmatprep.subr.bf16.mxu0 %v1458_v40  ;;  %2740 = vpow2.f32 %v1231_v38 }
 0x4d9   : > { %2611 = vmatpush3.bf16.msra.mxu0 %v1458_v40  ;;  %v2731_v12 = vpop.eup %2730  ;;  %2742 = vpow2.f32 %v1245_v37 }
 0x4da   : > { %v1233_v34 = vmul.f32 1.442695, %v1208_v45  ;;  %2744 = vpow2.f32 %v1237_v19  ;;  %v1275_v35 = vsel %vm556_vm0, %v2731_v12, 0.0  ;;  %2680 = vmatprep.subr.msk.bf16.mxu0 %vm841_vm2, %v1635_v49 }
 0x4db   : > { %2746 = vpow2.f32 %v1243_v43  ;;  %1276 = vadd.xlane.f32.xlu0 %v1275_v35  ;;  %v1519_v58 = vpop.permute.xlu1 %1518 }
 0x4dc   : > { %2748 = vpow2.f32 %v1233_v34 }
 0x4dd   : > { %v2733_v20 = vpop.eup %2732  ;;  %2750 = vpow2.f32 %v1171_v27  ;;  %v1163_v27 = vsub.f32 -inf, %v3196_v13 }
 0x4de   : > { %v1299_v39 = vsel %vm556_vm0, %v2733_v20, 0.0  ;;  %v2735_v18 = vpop.eup %2734  ;;  %2752 = vpow2.f32 %v1173_v24  ;;  %v1161_v24 = vsub.f32 -inf, %v3207_v26 }
 0x4df   : > { %1300 = vadd.xlane.f32.xlu0 %v1299_v39  ;;  %v1278_v51 = vsel %vm556_vm0, %v2735_v18, 0.0  ;;  %v1329_v52 = vpack.c.bf16 %v2735_v18, %v2731_v12  ;;  %2754 = vpow2.f32 %v1167_v32 }
 0x4e0   : > { %1279 = vadd.xlane.f32.xlu1 %v1278_v51  ;;  %2756 = vpow2.f32 %v1169_v36  ;;  %v1187_v36 = vmul.f32 1.442695, %v1161_v24 }
 0x4e1   : > { %v2737_v53 = vpop.eup %2736  ;;  %2604 = vmatprep.mubr.msk.bf16.mxu1 %vm556_vm0, %v1329_v52 }
 0x4e2   : > { %v1333_v55 = vpack.c.bf16 %v2737_v53, %v2733_v20  ;;  %v2739_v56 = vpop.eup %2738  ;;  %2605 = vmatmul.mubr.msk.bf16.vlgmr.msra.gmra.mxu1 %vm556_vm0, %v1330_v54  ;;  %v1302_v57 = vsel %vm556_vm0, %v2737_v53, 0.0 }
 0x4e3   : > { %2617 = vmatpush3.bf16.msra.mxu1 %v3041_v46  ;;  %v1293_v59 = vsel %vm556_vm0, %v2739_v56, 0.0 }
 0x4e4   : > { %2620 = vmatprep.mubr.msk.bf16.mxu1 %vm556_vm0, %v1333_v55  ;;  %2618 = vmatprep.subr.bf16.mxu1 %v1519_v58 }
 0x4e5   : > { %v2741_v60 = vpop.eup %2740  ;;  %1294 = vadd.xlane.f32.xlu0 %v1293_v59  ;;  %1303 = vadd.xlane.f32.xlu1 %v1302_v57 }
 0x4e6   : > { %v2743_v61 = vpop.eup %2742  ;;  %v1287_v62 = vsel %vm556_vm0, %v2741_v60, 0.0 }
 0x4e7   : > { %v2745_v0 = vpop.eup %2744  ;;  %2619 = vmatpush3.bf16.msra.mxu1 %v1519_v58  ;;  %v1308_v16 = vsel %vm556_vm0, %v2743_v61, 0.0 }
 0x4e8   : > { %v2747_v1 = vpop.eup %2746  ;;  %v1296_v3 = vsel %vm556_vm0, %v2745_v0, 0.0  ;;  %v1332_v10 = vpack.c.bf16 %v2745_v0, %v2739_v56  ;;  %2681 = vmatprep.subr.msk.bf16.mxu1 %vm841_vm2, %v1636_v28 }
 0x4e9   : > { %v2749_v5 = vpop.eup %2748  ;;  %1288 = vadd.xlane.f32.xlu0 %v1287_v62  ;;  %v1334_v7 = vpack.c.bf16 %v2743_v61, %v2747_v1  ;;  %1297 = vadd.xlane.f32.xlu1 %v1296_v3  ;;  %v1305_v8 = vsel %vm556_vm0, %v2747_v1, 0.0 }
 0x4ea   : > { %v1331_v46 = vpack.c.bf16 %v2749_v5, %v2741_v60  ;;  %v1290_v4 = vsel %vm556_vm0, %v2749_v5, 0.0  ;;  %v2751_v30 = vpop.eup %2750 }
 0x4eb   : > { %2621 = vmatmul.mubr.msk.bf16.vlgmr.msra.gmra.mxu1 %vm556_vm0, %v1334_v7  ;;  %v2753_v29 = vpop.eup %2752  ;;  %v1249_v19 = vmul.f32 0.0, %v2751_v30 }
 0x4ec   : > { %2612 = vmatprep.mubr.msk.bf16.mxu0 %vm556_vm0, %v1331_v46  ;;  %2631 = vmatpush3.bf16.msra.mxu1 %v1704_v31  ;;  %v2755_v37 = vpop.eup %2754  ;;  %v1250_v43 = vmul.f32 0.0, %v2753_v29  ;;  %v1762_v46 = vsel %vm841_vm2, %v1637_v47, 0 }
 0x4ed   : > { %1306 = vadd.xlane.f32.xlu0 %v1305_v8  ;;  %2613 = vmatmul.mubr.msk.bf16.vlgmr.msra.gmra.mxu0 %vm556_vm0, %v1332_v10  ;;  %v2757_v38 = vpop.eup %2756  ;;  %v1247_v12 = vmul.f32 0.0, %v2755_v37  ;;  %v1158_v10 = vsub.f32 -inf, %v3180_v2  ;;  %v1156_v8 = vsub.f32 -inf, %v3198_v14  ;;  %v1166_v2 = vsub.f32 -inf, %v3190_v48 }
 0x4ee   : > { %1291 = vadd.xlane.f32.xlu1 %v1290_v4  ;;  %2625 = vmatpush3.bf16.msra.mxu0 %v1646_v11  ;;  %v1248_v35 = vmul.f32 0.0, %v2757_v38  ;;  %v1157_v4 = vsub.f32 -inf, %v3176_v63  ;;  %v1155_v11 = vsub.f32 -inf, %v3188_v9  ;;  %v1165_v63 = vsub.f32 -inf, %v3184_v6 }
 0x4ef   : > { %2683 = vmatprep.subr.msk.bf16.mxu1 %vm841_vm2, %v3264_v44  ;;  %2682 = vmatprep.subr.msk.bf16.mxu0 %vm841_vm2, %v1637_v47  ;;  %v1181_v22 = vmul.f32 1.442695, %v1158_v10  ;;  %v1177_v28 = vmul.f32 1.442695, %v1156_v8  ;;  %v1191_v9 = vmul.f32 1.442695, %v1163_v27 }
 0x4f0   : > { %v1179_v17 = vmul.f32 1.442695, %v1157_v4  ;;  %v1175_v25 = vmul.f32 1.442695, %v1155_v11  ;;  %v1164_v14 = vsub.f32 -inf, %v3205_v15  ;;  %v1159_v47 = vsub.f32 -inf, %v3215_v23 }
 0x4f1   : > { %v1195_v13 = vmul.f32 1.442695, %v1165_v63  ;;  %v1197_v26 = vmul.f32 1.442695, %v1166_v2 }
 0x4f2   : > { %1309 = vadd.xlane.f32.xlu1 %v1308_v16  ;;  %v1193_v6 = vmul.f32 1.442695, %v1164_v14  ;;  %v1183_v37 = vmul.f32 1.442695, %v1159_v47 }
 0x50f   : > { %v1271_v41 = vpop.xlane.xlu0 %1270 }
 0x510   : > { %v1313_v45 = vadd.f32 %v1271_v41, %v1249_v19  ;;  %v1162_v41 = vsub.f32 -inf, %v3217_v33 }
 0x512   : > { %2758 = vrcp.f32 %v1313_v45  ;;  %v1189_v48 = vmul.f32 1.442695, %v1162_v41 }
 0x513   : > { %v1265_v50 = vpop.xlane.xlu0 %1264 }
 0x514   : > { %v1311_v20 = vadd.f32 %v1265_v50, %v1247_v12  ;;  %v1160_v50 = vsub.f32 -inf, %v3225_v42 }
 0x515   : > { %v1268_v34 = vpop.xlane.xlu1 %1267 }
 0x516   : > { %v1312_v39 = vadd.f32 %v1268_v34, %v1248_v35  ;;  %v1185_v15 = vmul.f32 1.442695, %v1160_v50 }
 0x517   : > { %v1274_v40 = vpop.xlane.xlu0 %1273 }
 0x518   : > { %v1314_v49 = vadd.f32 %v1274_v40, %v1250_v43 }
 0x51a   : > { %2760 = vrcp.f32 %v1314_v49 }
 0x51b   : > { %2762 = vrcp.f32 %v1311_v20 }
 0x51c   : > { %2764 = vrcp.f32 %v1312_v39 }
 0x51d   : > { %2766 = vpow2.f32 %v1179_v17 }
 0x51e   : > { %2768 = vpow2.f32 %v1181_v22 }
 0x51f   : > { %v2759_v54 = vpop.eup %2758  ;;  %2770 = vpow2.f32 %v1175_v25 }
 0x520   : > { %2772 = vpow2.f32 %v1177_v28 }
 0x521   : > { %2774 = vpow2.f32 %v1191_v9 }
 0x522   : > { %2776 = vpow2.f32 %v1187_v36 }
 0x523   : > { %2778 = vpow2.f32 %v1195_v13 }
 0x524   : > { %2780 = vpow2.f32 %v1197_v26 }
 0x525   : > { %2782 = vpow2.f32 %v1193_v6 }
 0x526   : > { %2784 = vpow2.f32 %v1189_v48 }
 0x527   : > { %v2761_v57 = vpop.eup %2760  ;;  %2786 = vpow2.f32 %v1183_v37 }
 0x528   : > { %v2763_v59 = vpop.eup %2762  ;;  %2788 = vpow2.f32 %v1185_v15 }
 0x529   : > { %v2765_v0 = vpop.eup %2764 }
 0x54f   : > { %v2598_v18 = vpop.f32.mrf.mxu0 }
 0x550   : > { %v1581_v52 = vadd.f32 %v2598_v18, %v1249_v19  ;;  %v1283_v16 = vpop.xlane.xlu0 %1282  ;;  %v2767_v19 = vpop.eup %2766 }
 0x551   : > { %v1381_v51 = vpop.f32.mrf.mxu0  ;;  %v2769_v23 = vpop.eup %2768 }
 0x552   : > { %v1579_v55 = vadd.f32 %v1381_v51, %v1247_v12  ;;  %v1613_v60 = vmul.f32 %v2759_v54, %v1581_v52  ;;  %v2771_v40 = vpop.eup %2770  ;;  %v1254_v45 = vmul.f32 0.0, %v2769_v23 }
 0x553   : > { %v2599_v53 = vpop.f32.mrf.mxu0  ;;  %v2773_v42 = vpop.eup %2772 }
 0x554   : > { %v1582_v56 = vadd.f32 %v2599_v53, %v1250_v43  ;;  %v1611_v1 = vmul.f32 %v2763_v59, %v1579_v55  ;;  %v1286_v21 = vpop.xlane.xlu1 %1285  ;;  %v1253_v43 = vmul.f32 0.0, %v2767_v19  ;;  %v2775_v20 = vpop.eup %2774  ;;  %v1252_v18 = vmul.f32 0.0, %v2773_v42 }
 0x555   : > { %v1384_v58 = vpop.f32.mrf.mxu0  ;;  %v1318_v39 = vadd.f32 %v1286_v21, %v1254_v45  ;;  %v2777_v51 = vpop.eup %2776 }
 0x556   : > { %v1614_v61 = vmul.f32 %v2761_v57, %v1582_v56  ;;  %v1580_v62 = vadd.f32 %v1384_v58, %v1248_v35  ;;  %v1317_v34 = vadd.f32 %v1283_v16, %v1253_v43  ;;  %v1251_v35 = vmul.f32 0.0, %v2771_v40  ;;  %v2779_v53 = vpop.eup %2778 }
 0x557   : > { %v2781_v55 = vpop.eup %2780  ;;  %v1259_v56 = vmul.f32 0.0, %v2775_v20  ;;  %v1257_v58 = vmul.f32 0.0, %v2777_v51 }
 0x558   : > { %v1628_v3 = vpack.c.bf16 %v1614_v61, %v1613_v60  ;;  %v1612_v5 = vmul.f32 %v2765_v0, %v1580_v62  ;;  %2790 = vrcp.f32 %v1317_v34  ;;  %v2783_v57 = vpop.eup %2782  ;;  %v1261_v62 = vmul.f32 0.0, %v2779_v53 }
 0x559   : > { %2792 = vrcp.f32 %v1318_v39  ;;  %v2785_v60 = vpop.eup %2784 }
 0x55a   : > { %v1627_v7 = vpack.c.bf16 %v1612_v5, %v1611_v1  ;;  %v2787_v1 = vpop.eup %2786  ;;  %v1262_v5 = vmul.f32 0.0, %v2781_v55  ;;  %v1258_v10 = vmul.f32 0.0, %v2785_v60 }
 0x55b   : > { %v1255_v16 = vmul.f32 0.0, %v2787_v1 }
 0x55c   : > { %2626 = vmatprep.mubr.msk.bf16.mxu0 %vm834_vm1, %v1627_v7  ;;  %v2789_v7 = vpop.eup %2788 }
 0x55d   : > { %2627 = vmatmul.mubr.msk.bf16.vlgmr.msra.gmra.mxu0 %vm834_vm1, %v1628_v3  ;;  %v1256_v21 = vmul.f32 0.0, %v2789_v7 }
 0x55e   : > { %2637 = vmatpush3.bf16.msra.mxu0 %v1762_v46  ;;  %v1260_v46 = vmul.f32 0.0, %v2783_v57 }
 0x564   : > { %v1277_v31 = vpop.xlane.xlu0 %1276 }
 0x565   : > { %v1315_v52 = vadd.f32 %v1277_v31, %v1251_v35  ;;  %v2791_v63 = vpop.eup %2790 }
 0x566   : > { %v2793_v9 = vpop.eup %2792 }
 0x567   : > { %2794 = vrcp.f32 %v1315_v52 }
 0x568   : > { %v1301_v30 = vpop.xlane.xlu0 %1300 }
 0x569   : > { %v1280_v32 = vpop.xlane.xlu1 %1279  ;;  %v1323_v61 = vadd.f32 %v1301_v30, %v1259_v56 }
 0x56a   : > { %v1316_v54 = vadd.f32 %v1280_v32, %v1252_v18 }
 0x56c   : > { %2796 = vrcp.f32 %v1316_v54 }
 0x56d   : > { %2798 = vrcp.f32 %v1323_v61 }
 0x56e   : > { %v1304_v29 = vpop.xlane.xlu1 %1303  ;;  %v1295_v38 = vpop.xlane.xlu0 %1294 }
 0x56f   : > { %v1321_v3 = vadd.f32 %v1295_v38, %v1257_v58  ;;  %v1324_v8 = vadd.f32 %v1304_v29, %v1260_v46 }
 0x571   : > { %2800 = vrcp.f32 %v1321_v3 }
 0x572   : > { %v1298_v33 = vpop.xlane.xlu1 %1297  ;;  %v1289_v12 = vpop.xlane.xlu0 %1288 }
 0x573   : > { %v1322_v17 = vadd.f32 %v1298_v33, %v1258_v10  ;;  %v1319_v22 = vadd.f32 %v1289_v12, %v1255_v16 }
 0x574   : > { %v2795_v36 = vpop.eup %2794 }
 0x576   : > { %v1307_v59 = vpop.xlane.xlu0 %1306 }
 0x577   : > { %v1292_v49 = vpop.xlane.xlu1 %1291  ;;  %v1325_v4 = vadd.f32 %v1307_v59, %v1261_v62 }
 0x578   : > { %v1320_v27 = vadd.f32 %v1292_v49, %v1256_v21 }
 0x579   : > { %2802 = vrcp.f32 %v1325_v4  ;;  %v2797_v26 = vpop.eup %2796 }
 0x57a   : > { %v2799_v38 = vpop.eup %2798 }
 0x57b   : > { %v1310_v0 = vpop.xlane.xlu1 %1309 }
 0x57c   : > { %v1326_v11 = vadd.f32 %v1310_v0, %v1262_v5 }
 0x57e   : > { %2804 = vrcp.f32 %v1326_v11  ;;  %v2801_v19 = vpop.eup %2800 }
 0x57f   : > { %2806 = vrcp.f32 %v1324_v8 }
 0x580   : > { %2808 = vrcp.f32 %v1322_v17 }
 0x581   : > { %2810 = vrcp.f32 %v1319_v22 }
 0x582   : > { %2812 = vrcp.f32 %v1320_v27 }
 0x586   : > { %v2803_v12 = vpop.eup %2802 }
 0x5a2   : > { %v2606_v25 = vpop.f32.mrf.mxu1 }
 0x5a3   : > { %v1585_v24 = vadd.f32 %v2606_v25, %v1253_v43 }
 0x5a4   : > { %v1442_v28 = vpop.f32.mrf.mxu1 }
 0x5a5   : > { %v1583_v32 = vadd.f32 %v1442_v28, %v1251_v35  ;;  %v1617_v41 = vmul.f32 %v2791_v63, %v1585_v24  ;;  %v2805_v35 = vpop.eup %2804 }
 0x5a6   : > { %v2607_v31 = vpop.f32.mrf.mxu1 }
 0x5a7   : > { %v1586_v2 = vadd.f32 %v2607_v31, %v1254_v45  ;;  %v1615_v30 = vmul.f32 %v2795_v36, %v1583_v32  ;;  %v1820_v45 = vsel %vm841_vm2, %v3264_v44, 0 }
 0x5a8   : > { %v1445_v14 = vpop.f32.mrf.mxu1 }
 0x5a9   : > { %v1618_v13 = vmul.f32 %v2793_v9, %v1586_v2  ;;  %v1584_v47 = vadd.f32 %v1445_v14, %v1252_v18  ;;  %v2807_v18 = vpop.eup %2806 }
 0x5aa   : > { %v2809_v55 = vpop.eup %2808 }
 0x5ab   : > { %v2622_v50 = vpop.f32.mrf.mxu1  ;;  %v1630_v6 = vpack.c.bf16 %v1618_v13, %v1617_v41  ;;  %v1616_v29 = vmul.f32 %v2797_v26, %v1584_v47 }
 0x5ac   : > { %v1593_v48 = vadd.f32 %v2622_v50, %v1261_v62 }
 0x5ad   : > { %v1564_v37 = vpop.f32.mrf.mxu1  ;;  %v2614_v15 = vpop.f32.mrf.mxu0  ;;  %v1629_v33 = vpack.c.bf16 %v1616_v29, %v1615_v30 }
 0x5ae   : > { %v1591_v23 = vadd.f32 %v1564_v37, %v1259_v56  ;;  %v1589_v40 = vadd.f32 %v2614_v15, %v1257_v58  ;;  %v1625_v49 = vmul.f32 %v2803_v12, %v1593_v48  ;;  %v2811_v58 = vpop.eup %2810 }
 0x5af   : > { %v2623_v42 = vpop.f32.mrf.mxu1  ;;  %v1503_v43 = vpop.f32.mrf.mxu0  ;;  %2632 = vmatprep.mubr.msk.bf16.mxu1 %vm834_vm1, %v1629_v33 }
 0x5b0   : > { %v1594_v34 = vadd.f32 %v2623_v42, %v1262_v5  ;;  %2633 = vmatmul.mubr.msk.bf16.vlgmr.msra.gmra.mxu1 %vm834_vm1, %v1630_v6  ;;  %v1587_v52 = vadd.f32 %v1503_v43, %v1255_v16  ;;  %v1623_v56 = vmul.f32 %v2799_v38, %v1591_v23  ;;  %v1621_v57 = vmul.f32 %v2801_v19, %v1589_v40  ;;  %v2813_v0 = vpop.eup %2812 }
 0x5b1   : > { %v1567_v20 = vpop.f32.mrf.mxu1  ;;  %v2615_v39 = vpop.f32.mrf.mxu0  ;;  %2643 = vmatpush3.bf16.msra.mxu1 %v1820_v45 }
 0x5b2   : > { %v1626_v51 = vmul.f32 %v2805_v35, %v1594_v34  ;;  %v1592_v53 = vadd.f32 %v1567_v20, %v1260_v46  ;;  %v1590_v54 = vadd.f32 %v2615_v39, %v1258_v10  ;;  %v1619_v1 = vmul.f32 %v2811_v58, %v1587_v52  ;;  %v2477_v34 = vld [vmem:[%s3436_s6] ss:$0 sm:$0xff] }
 0x5b3   : > { %v1506_v44 = vpop.f32.mrf.mxu0 }
 0x5b4   : > { %v1634_v59 = vpack.c.bf16 %v1626_v51, %v1625_v49  ;;  %v1624_v60 = vmul.f32 %v2807_v18, %v1592_v53  ;;  %v1622_v61 = vmul.f32 %v2809_v55, %v1590_v54  ;;  %v1588_v62 = vadd.f32 %v1506_v44, %v1256_v21 }
 0x5b6   : > { %v1633_v3 = vpack.c.bf16 %v1624_v60, %v1623_v56  ;;  %v1632_v5 = vpack.c.bf16 %v1622_v61, %v1621_v57  ;;  %v1620_v7 = vmul.f32 %v2813_v0, %v1588_v62 }
 0x5b8   : > { %v1631_v4 = vpack.c.bf16 %v1620_v7, %v1619_v1  ;;  %2644 = vmatprep.mubr.msk.bf16.mxu1 %vm834_vm1, %v1633_v3 }
 0x5b9   : > { %2645 = vmatmul.mubr.msk.bf16.vlgmr.msra.gmra.mxu1 %vm834_vm1, %v1634_v59 }
 0x5ba   : > { %2638 = vmatprep.mubr.msk.bf16.mxu0 %vm834_vm1, %v1631_v4 }
 0x5bb   : > { %2639 = vmatmul.mubr.msk.bf16.vlgmr.msra.gmra.mxu0 %vm834_vm1, %v1632_v5 }
 0x61d   : > { %v2628_v46 = vpop.f32.mrf.mxu0 }
 0x61e   : > { %v1885_v28 = vsel %vm556_vm0, %v2628_v46, 0.0 }
 0x61f   : > { %v1682_v10 = vpop.f32.mrf.mxu0 }
 0x620   : > { %v1871_v2 = vsel %vm556_vm0, %v1682_v10, 0.0 }
 0x621   : > { %v2629_v16 = vpop.f32.mrf.mxu0 }
 0x622   : > { %v1892_v26 = vsel %vm556_vm0, %v2629_v16, 0.0 }
 0x623   : > { %v1685_v25 = vpop.f32.mrf.mxu0 }
 0x624   : > { %v1878_v37 = vsel %vm556_vm0, %v1685_v25, 0.0 }
 0x670   : > { %v2634_v11 = vpop.f32.mrf.mxu1 }
 0x671   : > { %v1886_v22 = vsel %vm556_vm0, %v2634_v11, 0.0 }
 0x672   : > { %v1740_v8 = vpop.f32.mrf.mxu1  ;;  %v1887_v31 = vadd.f32 %v1886_v22, %v1885_v28 }
 0x673   : > { %v1872_v24 = vsel %vm556_vm0, %v1740_v8, 0.0 }
 0x674   : > { %v2635_v17 = vpop.f32.mrf.mxu1  ;;  %v1873_v36 = vadd.f32 %v1872_v24, %v1871_v2 }
 0x675   : > { %v1893_v9 = vsel %vm556_vm0, %v2635_v17, 0.0 }
 0x676   : > { %v1743_v21 = vpop.f32.mrf.mxu1  ;;  %v1894_v6 = vadd.f32 %v1893_v9, %v1892_v26  ;;  %v2478_v26 = vld [vmem:[%s3437_s7] ss:$0 sm:$0xff] }
 0x677   : > { %v1879_v50 = vsel %vm556_vm0, %v1743_v21, 0.0 }
 0x678   : > { %v1880_v19 = vadd.f32 %v1879_v50, %v1878_v37 }
 0x679   : > { %v2646_v27 = vpop.f32.mrf.mxu1 }
 0x67a   : > { %v1890_v15 = vsel %vm556_vm0, %v2646_v27, 0.0 }
 0x67b   : > { %v1856_v63 = vpop.f32.mrf.mxu1  ;;  %v2640_v32 = vpop.f32.mrf.mxu0 }
 0x67c   : > { %v1888_v14 = vsel %vm556_vm0, %v2640_v32, 0.0  ;;  %v1876_v38 = vsel %vm556_vm0, %v1856_v63, 0.0 }
 0x67d   : > { %v1889_v41 = vadd.f32 %v1888_v14, %v1887_v31  ;;  %v2647_v13 = vpop.f32.mrf.mxu1  ;;  %v1798_v47 = vpop.f32.mrf.mxu0 }
 0x67e   : > { %v1874_v30 = vsel %vm556_vm0, %v1798_v47, 0.0  ;;  %v1897_v20 = vsel %vm556_vm0, %v2647_v13, 0.0 }
 0x67f   : > { %v1875_v29 = vadd.f32 %v1874_v30, %v1873_v36  ;;  %v2641_v48 = vpop.f32.mrf.mxu0  ;;  %v1891_v23 = vadd.f32 %v1890_v15, %v1889_v41  ;;  %v1859_v42 = vpop.f32.mrf.mxu1  ;;  %v2479_v30 = vld [vmem:[%s3438_s8] ss:$0 sm:$0xff] }
 0x680   : > { %v1895_v33 = vsel %vm556_vm0, %v2641_v48, 0.0  ;;  %v1883_v39 = vsel %vm556_vm0, %v1859_v42, 0.0 }
 0x681   : > { %v1877_v40 = vadd.f32 %v1876_v38, %v1875_v29  ;;  %v1896_v43 = vadd.f32 %v1895_v33, %v1894_v6  ;;  %v1801_v45 = vpop.f32.mrf.mxu0  ;;  %v1908_v53 = vadd.f32 %v2477_v34, %v1891_v23  ;;  %v2846_v33 = vld [vmem:[%s2969_s0] sm:$0xff] }
 0x682   : > { %v1881_v12 = vsel %vm556_vm0, %v1801_v45, 0.0 }
 0x683   : > { %v1882_v35 = vadd.f32 %v1881_v12, %v1880_v19  ;;  %v1906_v49 = vadd.f32 %v2477_v34, %v1877_v40  ;;  %v1898_v18 = vadd.f32 %v1897_v20, %v1896_v43  ;;  %v1918_v55 = vsel %vm556_vm0, %v1908_v53, 0.0 }
 0x685   : > { %v1884_v51 = vadd.f32 %v1883_v39, %v1882_v35  ;;  %v1912_v52 = vsel %vm556_vm0, %v1906_v49, 0.0  ;;  %v1909_v57 = vadd.f32 %v2477_v34, %v1898_v18  ;;  %v2847_v35 = vld [vmem:[%s2969_s0 + $0x10] sm:$0xff]  ;;  %v2848_v39 = vld [vmem:[%s2969_s0 + $0x8] sm:$0xff] }
 0x686   : > { %1913 = vadd.xlane.f32.xlu0 %v1912_v52 }
 0x687   : > { %v1907_v54 = vadd.f32 %v2477_v34, %v1884_v51  ;;  %v1921_v44 = vsel %vm556_vm0, %v1909_v57, 0.0 }
 0x689   : > { %v1915_v56 = vsel %vm556_vm0, %v1907_v54, 0.0 }
 0x68a   : > { %1919 = vadd.xlane.f32.xlu0 %v1918_v55  ;;  %1916 = vadd.xlane.f32.xlu1 %v1915_v56 }
 0x68e   : > { %1922 = vadd.xlane.f32.xlu1 %v1921_v44 }
 0x70f   : > { %v1914_v58 = vpop.xlane.xlu0 %1913 }
 0x710   : > { %v1924_v59 = vmul.f32 0.03125, %v1914_v58 }
 0x712   : > { %v1928_v60 = vsub.f32 %v1906_v49, %v1924_v59 }
 0x713   : > { %v1920_v61 = vpop.xlane.xlu0 %1919  ;;  %v1917_v62 = vpop.xlane.xlu1 %1916 }
 0x714   : > { %v1926_v0 = vmul.f32 0.03125, %v1920_v61  ;;  %v1925_v1 = vmul.f32 0.03125, %v1917_v62  ;;  %v1932_v3 = vmul.f32 %v1928_v60, %v1928_v60 }
 0x716   : > { %v1930_v5 = vsub.f32 %v1908_v53, %v1926_v0  ;;  %v1929_v7 = vsub.f32 %v1907_v54, %v1925_v1  ;;  %v1936_v4 = vsel %vm556_vm0, %v1932_v3, 0.0  ;;  %v2849_v54 = vld [vmem:[%s2969_s0 + $0x18] sm:$0xff] }
 0x717   : > { %1937 = vadd.xlane.f32.xlu0 %v1936_v4  ;;  %v1923_v46 = vpop.xlane.xlu1 %1922 }
 0x718   : > { %v1927_v10 = vmul.f32 0.03125, %v1923_v46  ;;  %v1934_v11 = vmul.f32 %v1930_v5, %v1930_v5  ;;  %v1933_v8 = vmul.f32 %v1929_v7, %v1929_v7 }
 0x71a   : > { %v1931_v16 = vsub.f32 %v1909_v57, %v1927_v10  ;;  %v1942_v17 = vsel %vm556_vm0, %v1934_v11, 0.0  ;;  %v1939_v21 = vsel %vm556_vm0, %v1933_v8, 0.0 }
 0x71b   : > { %1943 = vadd.xlane.f32.xlu0 %v1942_v17  ;;  %1940 = vadd.xlane.f32.xlu1 %v1939_v21 }
 0x71c   : > { %v1935_v22 = vmul.f32 %v1931_v16, %v1931_v16 }
 0x71e   : > { %v1945_v25 = vsel %vm556_vm0, %v1935_v22, 0.0  ;;  %v2700_v22 = vld [vmem:[%s3441_s11 + $0x8] sm:$0xff]  }
 0x71f   : > { %1946 = vadd.xlane.f32.xlu1 %v1945_v25  ;;  %v2701_v25 = vld [vmem:[%s3441_s11] sm:$0xff]   ;;  %2648 = vmatprep.subr.bf16.mxu0 %v2700_v22 }
 0x720   : > { %2649 = vmatpush3.bf16.msra.mxu0 %v2700_v22 }
 0x721   : > { %2650 = vmatprep.subr.bf16.mxu0 %v2701_v25 }
 0x724   : > { %2651 = vmatpush3.bf16.msra.mxu0 %v2701_v25 }
 0x7a0   : > { %v1938_v27 = vpop.xlane.xlu0 %1937 }
 0x7a1   : > { %v1948_v28 = vmul.f32 0.03125, %v1938_v27 }
 0x7a3   : > { %v1952_v24 = vadd.f32 1e-05, %v1948_v28 }
 0x7a4   : > { %v1944_v31 = vpop.xlane.xlu0 %1943  ;;  %v1941_v63 = vpop.xlane.xlu1 %1940 }
 0x7a5   : > { %2814 = vrsqrt.f32 %v1952_v24  ;;  %v1950_v32 = vmul.f32 0.03125, %v1944_v31  ;;  %v1949_v2 = vmul.f32 0.03125, %v1941_v63 }
 0x7a7   : > { %v1954_v9 = vadd.f32 1e-05, %v1950_v32  ;;  %v1953_v14 = vadd.f32 1e-05, %v1949_v2 }
 0x7a8   : > { %v1947_v36 = vpop.xlane.xlu1 %1946 }
 0x7a9   : > { %2816 = vrsqrt.f32 %v1954_v9  ;;  %v1951_v41 = vmul.f32 0.03125, %v1947_v36 }
 0x7aa   : > { %2818 = vrsqrt.f32 %v1953_v14 }
 0x7ab   : > { %v1955_v13 = vadd.f32 1e-05, %v1951_v41 }
 0x7ad   : > { %2820 = vrsqrt.f32 %v1955_v13 }
 0x7b2   : > { %v2815_v47 = vpop.eup %2814 }
 0x7b3   : > { %v1960_v50 = vmul.f32 %v2815_v47, %v1928_v60 }
 0x7b5   : > { %v1970_v6 = vmul.f32 %v2478_v26, %v1960_v50  ;;  %v2480_v50 = vld [vmem:[%s3439_s9] ss:$0 sm:$0xff] }
 0x7b6   : > { %v2817_v29 = vpop.eup %2816 }
 0x7b7   : > { %v2819_v48 = vpop.eup %2818  ;;  %v1980_v37 = vadd.f32 %v2479_v30, %v1970_v6  ;;  %v1962_v15 = vmul.f32 %v2817_v29, %v1930_v5 }
 0x7b8   : > { %v1961_v38 = vmul.f32 %v2819_v48, %v1929_v7 }
 0x7b9   : > { %v3329_v19 = vadd.f32 %v2846_v33, %v1980_v37  ;;  %v1972_v23 = vmul.f32 %v2478_v26, %v1962_v15  ;;  %v2481_v15 = vld [vmem:[%s3440_s10] ss:$0 sm:$0xff] }
 0x7ba   : > { %v2821_v40 = vpop.eup %2820  ;;  %v1971_v42 = vmul.f32 %v2478_v26, %v1961_v38 }
 0x7bb   : > { %v1990_v43 = vsel %vm556_vm0, %v3329_v19, 0.0  ;;  %v1982_v45 = vadd.f32 %v2479_v30, %v1972_v23  ;;  %v1963_v12 = vmul.f32 %v2821_v40, %v1931_v16 }
 0x7bc   : > { %1991 = vadd.xlane.f32.xlu0 %v1990_v43  ;;  %v1981_v34 = vadd.f32 %v2479_v30, %v1971_v42 }
 0x7bd   : > { %v3334_v49 = vadd.f32 %v2847_v35, %v1982_v45  ;;  %v1973_v20 = vmul.f32 %v2478_v26, %v1963_v12 }
 0x7be   : > { %v3337_v18 = vadd.f32 %v2848_v39, %v1981_v34  ;;  %v2702_v39 = vld [vmem:[%s3443_s13 + $0x38] sm:$0xff]  }
 0x7bf   : > { %v1996_v51 = vsel %vm556_vm0, %v3334_v49, 0.0  ;;  %v1983_v52 = vadd.f32 %v2479_v30, %v1973_v20  ;;  %2656 = vmatprep.subr.bf16.mxu1 %v2702_v39 }
 0x7c0   : > { %1997 = vadd.xlane.f32.xlu0 %v1996_v51  ;;  %v1993_v53 = vsel %vm556_vm0, %v3337_v18, 0.0  ;;  %2657 = vmatpush3.bf16.msra.mxu1 %v2702_v39  ;;  %v2703_v51 = vld [vmem:[%s3443_s13 + $0x30] sm:$0xff]  }
 0x7c1   : > { %1994 = vadd.xlane.f32.xlu1 %v1993_v53  ;;  %v3344_v55 = vadd.f32 %v2849_v54, %v1983_v52  ;;  %2658 = vmatprep.subr.bf16.mxu1 %v2703_v51  ;;  %v2704_v52 = vld [vmem:[%s3443_s13 + $0x28] sm:$0xff]   ;;  %v2705_v53 = vld [vmem:[%s3443_s13 + $0x20] sm:$0xff]   ;;  %v2706_v54 = vld [vmem:[%s3443_s13 + $0x18] sm:$0xff]  }
 0x7c3   : > { %v1999_v56 = vsel %vm556_vm0, %v3344_v55, 0.0 }
 0x7c4   : > { %2659 = vmatpush3.bf16.msra.mxu1 %v2703_v51 }
 0x7c5   : > { %2000 = vadd.xlane.f32.xlu1 %v1999_v56  ;;  %2660 = vmatprep.subr.bf16.mxu1 %v2704_v52  ;;  %v2707_v56 = vld [vmem:[%s3443_s13 + $0x10] sm:$0xff]  }
 0x7c8   : > { %2661 = vmatpush3.bf16.msra.mxu1 %v2704_v52 }
 0x7c9   : > { %2662 = vmatprep.subr.bf16.mxu1 %v2705_v53 }
 0x7cc   : > { %2663 = vmatpush3.bf16.msra.mxu1 %v2705_v53 }
 0x7cd   : > { %2664 = vmatprep.subr.bf16.mxu1 %v2706_v54 }
 0x7d0   : > { %2665 = vmatpush3.bf16.msra.mxu1 %v2706_v54 }
 0x7d1   : > { %2666 = vmatprep.subr.bf16.mxu1 %v2707_v56 }
 0x7d4   : > { %2667 = vmatpush3.bf16.msra.mxu1 %v2707_v56 }
 0x845   : > { %v1992_v57 = vpop.xlane.xlu0 %1991 }
 0x846   : > { %v2002_v44 = vmul.f32 0.03125, %v1992_v57  ;;  %v2708_v57 = vld [vmem:[%s3443_s13 + $0x8] sm:$0xff]  }
 0x847   : > { %2668 = vmatprep.subr.bf16.mxu1 %v2708_v57 }
 0x848   : > { %v2006_v58 = vsub.f32 %v3329_v19, %v2002_v44  ;;  %v2709_v44 = vld [vmem:[%s3443_s13] sm:$0xff]   ;;  %2669 = vmatpush3.bf16.msra.mxu1 %v2708_v57 }
 0x849   : > { %v1998_v59 = vpop.xlane.xlu0 %1997  ;;  %2670 = vmatprep.subr.bf16.mxu1 %v2709_v44 }
 0x84a   : > { %v2004_v60 = vmul.f32 0.03125, %v1998_v59  ;;  %v1995_v61 = vpop.xlane.xlu1 %1994  ;;  %v2010_v62 = vmul.f32 %v2006_v58, %v2006_v58 }
 0x84b   : > { %v2003_v0 = vmul.f32 0.03125, %v1995_v61 }
 0x84c   : > { %v2008_v1 = vsub.f32 %v3334_v49, %v2004_v60  ;;  %v2014_v3 = vsel %vm556_vm0, %v2010_v62, 0.0  ;;  %2671 = vmatpush3.bf16.msra.mxu1 %v2709_v44 }
 0x84d   : > { %v2007_v5 = vsub.f32 %v3337_v18, %v2003_v0  ;;  %2015 = vadd.xlane.f32.xlu0 %v2014_v3 }
 0x84e   : > { %v2001_v7 = vpop.xlane.xlu1 %2000  ;;  %v2012_v4 = vmul.f32 %v2008_v1, %v2008_v1 }
 0x84f   : > { %v2005_v46 = vmul.f32 0.03125, %v2001_v7  ;;  %v2011_v10 = vmul.f32 %v2007_v5, %v2007_v5 }
 0x850   : > { %v2020_v11 = vsel %vm556_vm0, %v2012_v4, 0.0 }
 0x851   : > { %v2009_v8 = vsub.f32 %v3344_v55, %v2005_v46  ;;  %2021 = vadd.xlane.f32.xlu0 %v2020_v11  ;;  %v2017_v16 = vsel %vm556_vm0, %v2011_v10, 0.0 }
 0x852   : > { %2018 = vadd.xlane.f32.xlu1 %v2017_v16 }
 0x853   : > { %v2013_v17 = vmul.f32 %v2009_v8, %v2009_v8 }
 0x855   : > { %v2023_v21 = vsel %vm556_vm0, %v2013_v17, 0.0 }
 0x856   : > { %2024 = vadd.xlane.f32.xlu1 %v2023_v21 }
 0x8d6   : > { %v2016_v27 = vpop.xlane.xlu0 %2015 }
 0x8d7   : > { %v2026_v28 = vmul.f32 0.03125, %v2016_v27 }
 0x8d9   : > { %v2030_v24 = vadd.f32 1e-05, %v2026_v28 }
 0x8da   : > { %v2022_v31 = vpop.xlane.xlu0 %2021 }
 0x8db   : > { %2822 = vrsqrt.f32 %v2030_v24  ;;  %v2028_v63 = vmul.f32 0.03125, %v2022_v31  ;;  %v2019_v32 = vpop.xlane.xlu1 %2018 }
 0x8dc   : > { %v2027_v2 = vmul.f32 0.03125, %v2019_v32 }
 0x8dd   : > { %v2032_v9 = vadd.f32 1e-05, %v2028_v63 }
 0x8de   : > { %v2031_v14 = vadd.f32 1e-05, %v2027_v2 }
 0x8df   : > { %2824 = vrsqrt.f32 %v2032_v9  ;;  %v2025_v36 = vpop.xlane.xlu1 %2024 }
 0x8e0   : > { %2826 = vrsqrt.f32 %v2031_v14  ;;  %v2029_v41 = vmul.f32 0.03125, %v2025_v36 }
 0x8e2   : > { %v2033_v13 = vadd.f32 1e-05, %v2029_v41 }
 0x8e4   : > { %2828 = vrsqrt.f32 %v2033_v13 }
 0x8e8   : > { %v2823_v47 = vpop.eup %2822 }
 0x8e9   : > { %v2038_v26 = vmul.f32 %v2823_v47, %v2006_v58  ;;  %v2482_v58 = vld [vmem:[%s3442_s12] ss:$0 sm:$0xff] }
 0x8eb   : > { %v2048_v37 = vmul.f32 %v2480_v50, %v2038_v26 }
 0x8ec   : > { %v2825_v30 = vpop.eup %2824 }
 0x8ed   : > { %v2827_v6 = vpop.eup %2826  ;;  %v2040_v29 = vmul.f32 %v2825_v30, %v2008_v1  ;;  %v2058_v40 = vadd.f32 %v2481_v15, %v2048_v37 }
 0x8ee   : > { %v2039_v48 = vmul.f32 %v2827_v6, %v2007_v5 }
 0x8ef   : > { %v2050_v43 = vmul.f32 %v2480_v50, %v2040_v29 }
 0x8f0   : > { %v2049_v38 = vmul.f32 %v2480_v50, %v2039_v48 }
 0x8f1   : > { %v2829_v33 = vpop.eup %2828  ;;  %v2060_v34 = vadd.f32 %v2481_v15, %v2050_v43 }
 0x8f2   : > { %v2041_v23 = vmul.f32 %v2829_v33, %v2009_v8  ;;  %v2059_v42 = vadd.f32 %v2481_v15, %v2049_v38 }
 0x8f4   : > { %v2062_v45 = vpack.c.bf16 %v2059_v42, %v2058_v40  ;;  %v2051_v12 = vmul.f32 %v2480_v50, %v2041_v23 }
 0x8f6   : > { %2652 = vmatprep.mubr.msk.bf16.mxu0 %vm556_vm0, %v2062_v45  ;;  %v2061_v35 = vadd.f32 %v2481_v15, %v2051_v12  ;;  %v2487_v12 = vld [vmem:[%s3444_s14] ss:$0 sm:$0xff] }
 0x8f8   : > { %v2063_v20 = vpack.c.bf16 %v2061_v35, %v2060_v34 }
 0x8fa   : > { %2653 = vmatmul.mubr.msk.bf16.vlgmr.msra.gmra.mxu0 %vm556_vm0, %v2063_v20 }
 0x9ba   : > { %v2654_v59 = vpop.f32.mrf.mxu0 }
 0x9bb   : > { %v2136_v60 = vadd.f32 %v2654_v59, %v2482_v58 }
 0x9bc   : > { %v2127_v61 = vpop.f32.mrf.mxu0 }
 0x9bd   : > { %v2152_v62 = vmul.f32 0.044715, %v2136_v60  ;;  %v2128_v0 = vadd.f32 %v2482_v58, %v2127_v61  ;;  %v2148_v16 = vmul.f32 0.7978846, %v2136_v60  ;;  %v2144_v15 = vmul.f32 0.5, %v2136_v60 }
 0x9be   : > { %v2655_v1 = vpop.f32.mrf.mxu0 }
 0x9bf   : > { %v2156_v3 = vmul.f32 %v2152_v62, %v2136_v60  ;;  %v2150_v5 = vmul.f32 0.044715, %v2128_v0  ;;  %v2139_v7 = vadd.f32 %v2655_v1, %v2482_v58  ;;  %v2146_v17 = vmul.f32 0.7978846, %v2128_v0 }
 0x9c0   : > { %v2130_v4 = vpop.f32.mrf.mxu0  ;;  %v2142_v29 = vmul.f32 0.5, %v2128_v0 }
 0x9c1   : > { %v2160_v46 = vadd.f32 1.0, %v2156_v3  ;;  %v2154_v10 = vmul.f32 %v2150_v5, %v2128_v0  ;;  %v2153_v11 = vmul.f32 0.044715, %v2139_v7  ;;  %v2131_v8 = vadd.f32 %v2482_v58, %v2130_v4 }
 0x9c2   : > { %v2149_v24 = vmul.f32 0.7978846, %v2139_v7  ;;  %v2145_v30 = vmul.f32 0.5, %v2139_v7 }
 0x9c3   : > { %v2158_v21 = vadd.f32 1.0, %v2154_v10  ;;  %v2157_v22 = vmul.f32 %v2153_v11, %v2139_v7  ;;  %v2151_v25 = vmul.f32 0.044715, %v2131_v8  ;;  %v2164_v27 = vmul.f32 %v2160_v46, %v2148_v16 }
 0x9c4   : > { %v2147_v2 = vmul.f32 0.7978846, %v2131_v8  ;;  %v2143_v48 = vmul.f32 0.5, %v2131_v8 }
 0x9c5   : > { %v2162_v28 = vmul.f32 %v2158_v21, %v2146_v17  ;;  %v2161_v31 = vadd.f32 1.0, %v2157_v22  ;;  %v2155_v63 = vmul.f32 %v2151_v25, %v2131_v8 }
 0x9c7   : > { %2830 = vtanh.f32 %v2162_v28  ;;  %v2165_v32 = vmul.f32 %v2161_v31, %v2149_v24  ;;  %v2159_v9 = vadd.f32 1.0, %v2155_v63 }
 0x9c8   : > { %2832 = vtanh.f32 %v2164_v27 }
 0x9c9   : > { %2834 = vtanh.f32 %v2165_v32  ;;  %v2163_v14 = vmul.f32 %v2159_v9, %v2147_v2 }
 0x9cb   : > { %2836 = vtanh.f32 %v2163_v14 }
 0x9d4   : > { %v2831_v36 = vpop.eup %2830 }
 0x9d5   : > { %v2833_v41 = vpop.eup %2832  ;;  %v2170_v47 = vadd.f32 1.0, %v2831_v36 }
 0x9d6   : > { %v2835_v13 = vpop.eup %2834  ;;  %v2172_v6 = vadd.f32 1.0, %v2833_v41 }
 0x9d7   : > { %v2173_v26 = vadd.f32 1.0, %v2835_v13  ;;  %v2174_v33 = vmul.f32 %v2170_v47, %v2142_v29 }
 0x9d8   : > { %v2837_v50 = vpop.eup %2836  ;;  %v2176_v40 = vmul.f32 %v2172_v6, %v2144_v15 }
 0x9d9   : > { %v2171_v37 = vadd.f32 1.0, %v2837_v50  ;;  %v2177_v38 = vmul.f32 %v2173_v26, %v2145_v30  ;;  %v2496_v26 = vld [vmem:[%s3445_s15] ss:$0 sm:$0xff] }
 0x9da   : > { %v2497_v30 = vld [vmem:[%s3446_s16] ss:$0 sm:$0xff] }
 0x9db   : > { %v2175_v23 = vmul.f32 %v2171_v37, %v2143_v48  ;;  %v2179_v43 = vpack.c.bf16 %v2177_v38, %v2176_v40 }
 0x9dd   : > { %v2178_v42 = vpack.c.bf16 %v2175_v23, %v2174_v33 }
 0x9df   : > { %2672 = vmatprep.mubr.bf16.mxu1 %v2178_v42 }
 0x9e0   : > { %2673 = vmatmul.mubr.bf16.vlgmr.msra.gmra.mxu1 %v2179_v43 }
 0xaa0   : > { %v2674_v45 = vpop.f32.mrf.mxu1 }
 0xaa1   : > { %v2294_v39 = vadd.f32 %v2674_v45, %v2487_v12 }
 0xaa2   : > { %v2285_v34 = vpop.f32.mrf.mxu1 }
 0xaa3   : > { %v2286_v35 = vadd.f32 %v2487_v12, %v2285_v34  ;;  %v2308_v57 = vsel %vm556_vm0, %v2294_v39, 0.0 }
 0xaa4   : > { %v2675_v20 = vpop.f32.mrf.mxu1 }
 0xaa5   : > { %v2302_v51 = vsel %vm556_vm0, %v2286_v35, 0.0  ;;  %v2297_v54 = vadd.f32 %v2675_v20, %v2487_v12 }
 0xaa6   : > { %v2288_v52 = vpop.f32.mrf.mxu1  ;;  %2303 = vadd.xlane.f32.xlu0 %v2302_v51 }
 0xaa7   : > { %v2289_v53 = vadd.f32 %v2487_v12, %v2288_v52  ;;  %v2311_v44 = vsel %vm556_vm0, %v2297_v54, 0.0 }
 0xaa9   : > { %v2305_v56 = vsel %vm556_vm0, %v2289_v53, 0.0 }
 0xaaa   : > { %2306 = vadd.xlane.f32.xlu1 %v2305_v56  ;;  %2309 = vadd.xlane.f32.xlu0 %v2308_v57 }
 0xaae   : > { %2312 = vadd.xlane.f32.xlu1 %v2311_v44 }
 0xb2f   : > { %v2304_v58 = vpop.xlane.xlu0 %2303 }
 0xb30   : > { %v2314_v59 = vmul.f32 0.03125, %v2304_v58 }
 0xb32   : > { %v2318_v60 = vsub.f32 %v2286_v35, %v2314_v59 }
 0xb33   : > { %v2307_v61 = vpop.xlane.xlu1 %2306  ;;  %v2310_v62 = vpop.xlane.xlu0 %2309 }
 0xb34   : > { %v2315_v0 = vmul.f32 0.03125, %v2307_v61  ;;  %v2316_v1 = vmul.f32 0.03125, %v2310_v62  ;;  %v2322_v3 = vmul.f32 %v2318_v60, %v2318_v60 }
 0xb36   : > { %v2319_v5 = vsub.f32 %v2289_v53, %v2315_v0  ;;  %v2320_v7 = vsub.f32 %v2294_v39, %v2316_v1  ;;  %v2326_v4 = vsel %vm556_vm0, %v2322_v3, 0.0 }
 0xb37   : > { %v2313_v46 = vpop.xlane.xlu1 %2312  ;;  %2327 = vadd.xlane.f32.xlu0 %v2326_v4 }
 0xb38   : > { %v2317_v10 = vmul.f32 0.03125, %v2313_v46  ;;  %v2323_v11 = vmul.f32 %v2319_v5, %v2319_v5  ;;  %v2324_v8 = vmul.f32 %v2320_v7, %v2320_v7 }
 0xb3a   : > { %v2321_v16 = vsub.f32 %v2297_v54, %v2317_v10  ;;  %v2329_v17 = vsel %vm556_vm0, %v2323_v11, 0.0  ;;  %v2332_v21 = vsel %vm556_vm0, %v2324_v8, 0.0 }
 0xb3b   : > { %2330 = vadd.xlane.f32.xlu1 %v2329_v17  ;;  %2333 = vadd.xlane.f32.xlu0 %v2332_v21 }
 0xb3c   : > { %v2325_v22 = vmul.f32 %v2321_v16, %v2321_v16 }
 0xb3e   : > { %v2335_v25 = vsel %vm556_vm0, %v2325_v22, 0.0 }
 0xb3f   : > { %2336 = vadd.xlane.f32.xlu1 %v2335_v25 }
 0xbc0   : > { %v2328_v27 = vpop.xlane.xlu0 %2327 }
 0xbc1   : > { %v2338_v28 = vmul.f32 0.03125, %v2328_v27 }
 0xbc3   : > { %v2342_v24 = vadd.f32 1e-05, %v2338_v28 }
 0xbc4   : > { %v2331_v31 = vpop.xlane.xlu1 %2330  ;;  %v2334_v63 = vpop.xlane.xlu0 %2333 }
 0xbc5   : > { %2838 = vrsqrt.f32 %v2342_v24  ;;  %v2339_v32 = vmul.f32 0.03125, %v2331_v31  ;;  %v2340_v2 = vmul.f32 0.03125, %v2334_v63 }
 0xbc7   : > { %v2343_v9 = vadd.f32 1e-05, %v2339_v32  ;;  %v2344_v14 = vadd.f32 1e-05, %v2340_v2 }
 0xbc8   : > { %v2337_v36 = vpop.xlane.xlu1 %2336 }
 0xbc9   : > { %2840 = vrsqrt.f32 %v2343_v9  ;;  %v2341_v41 = vmul.f32 0.03125, %v2337_v36 }
 0xbca   : > { %2842 = vrsqrt.f32 %v2344_v14 }
 0xbcb   : > { %v2345_v13 = vadd.f32 1e-05, %v2341_v41 }
 0xbcd   : > { %2844 = vrsqrt.f32 %v2345_v13 }
 0xbd2   : > { %v2839_v47 = vpop.eup %2838 }
 0xbd3   : > { %v2350_v50 = vmul.f32 %v2839_v47, %v2318_v60 }
 0xbd5   : > { %v2360_v6 = vmul.f32 %v2496_v26, %v2350_v50 }
 0xbd6   : > { %v2841_v29 = vpop.eup %2840 }
 0xbd7   : > { %v2843_v48 = vpop.eup %2842  ;;  %v2370_v37 = vadd.f32 %v2497_v30, %v2360_v6  ;;  %v2351_v15 = vmul.f32 %v2841_v29, %v2319_v5 }
 0xbd8   : > { %v2352_v38 = vmul.f32 %v2843_v48, %v2320_v7 }
 0xbd9   : > { %v2374_v33 = vadd.f32 %v2370_v37, %v3329_v19  ;;  %v2361_v23 = vmul.f32 %v2496_v26, %v2351_v15 }
 0xbda   : > { %v2845_v40 = vpop.eup %2844  ;;  %v2362_v42 = vmul.f32 %v2496_v26, %v2352_v38 }
 0xbdb   : > { %2378 = vst.msk [vmem:[%s548_s22] sm:$0xff] %vm556_vm0, %v2374_v33  ;;  %v2371_v43 = vadd.f32 %v2497_v30, %v2361_v23  ;;  %v2353_v45 = vmul.f32 %v2845_v40, %v2321_v16 }
 0xbdc   : > { %v2372_v12 = vadd.f32 %v2497_v30, %v2362_v42 }
 0xbdd   : > { %v2375_v34 = vadd.f32 %v2371_v43, %v3337_v18  ;;  %v2363_v35 = vmul.f32 %v2496_v26, %v2353_v45 }
 0xbde   : > { %v2376_v20 = vadd.f32 %v2372_v12, %v3334_v49 }
 0xbdf   : > { %2379 = vst.msk [vmem:[%s548_s22 + $0x8] sm:$0xff] %vm556_vm0, %v2375_v34  ;;  %v2373_v39 = vadd.f32 %v2497_v30, %v2363_v35 }
 0xbe0   : > { %2380 = vst.msk [vmem:[%s548_s22 + $0x10] sm:$0xff] %vm556_vm0, %v2376_v20 }
 0xbe1   : > { %v2377_v19 = vadd.f32 %v2373_v39, %v3344_v55 }
 0xbe3   : > { %2381 = vst.msk [vmem:[%s548_s22 + $0x18] sm:$0xff] %vm556_vm0, %v2377_v19 }
 0xbe4 PF: > { %s27_s24 = sadd.s32 1, %s2856_s24  }
 0xbe5   : > { %p24_p4 = scmp.ge.s32.totalorder %s27_s24, 4  }
 0xbe7   :  { %26 = sbr.rel (!%p24_p4) target bundleno = 3 (0x3), region = 118 }

</bundles_post_ra>
